<compile_context>
chip_gen: v7x
topology: tpu7x:2x2x1
jax: 0.10.0
libtpu: 0.0.40
codegen_flags: <defaults>
</compile_context>

<pallas_src>
import jax
import jax.numpy as jnp
from jax import lax
from jax.experimental import pallas as pl
from jax.experimental.pallas import tpu as pltpu


def _fold_conv_bn(w, gamma, beta, mean, var, eps=1e-5):
    """Fold eval-mode BatchNorm2d into the preceding bias-free conv."""
    # TODO(synk): training-mode BatchNorm (batch statistics) not implemented;
    # eval-mode running stats are folded into the conv weights.
    scale = gamma / jnp.sqrt(var + eps)
    w_eff = w * scale[:, None, None, None]
    b_eff = beta - scale * mean
    return w_eff, b_eff


def double_conv(x, params, *, down=True):
    """DoubleConv forward.  x: (N, Cin, H, W) NCHW -> (N, Cout, Ho, Wo) NCHW."""
    N, Cin, H, W = x.shape
    w1, w2, wr = params["w1"], params["w2"], params["wr"]
    Cmid, Cout = w1.shape[0], w2.shape[0]

    if down:
        # TODO(synk): MaxPool2d ceil_mode tail for odd H/W not implemented.
        assert H % 2 == 0 and W % 2 == 0, "down path requires even H, W"
        Ho, Wo = H // 2, W // 2
    else:
        Ho, Wo = H, W

    Hp, Wp = H + 2, W + 2          # spatially zero-padded plane
    P = Hp * Wp                    # flattened padded plane length (lanes)
    G = Wp + 1                     # flat margin = max |tap shift|
    PM = P + 2 * G                 # margined flat length
    L = P - (Wp + 1)               # window length covering all output pixels
    S = Ho * Wo                    # number of output pixels per image

    # ---- fold BN (eval) into the two 3x3 convs ----
    w1f, b1 = _fold_conv_bn(w1, params["bn1_gamma"], params["bn1_beta"],
                            params["bn1_mean"], params["bn1_var"])
    w2f, b2 = _fold_conv_bn(w2, params["bn2_gamma"], params["bn2_beta"],
                            params["bn2_mean"], params["bn2_var"])
    # tap-major weight stacks: tap t = kh*3 + kw -> (Cout, Cin) matrix
    w1s = jnp.transpose(w1f, (2, 3, 0, 1)).reshape(9, Cmid, Cin)
    w2s = jnp.transpose(w2f, (2, 3, 0, 1)).reshape(9, Cout, Cmid)
    wr2 = wr.reshape(Cout, Cin)
    b1c = b1.reshape(Cmid, 1)
    b2c = b2.reshape(Cout, 1)

    # ---- host prep: zero pads + contiguous reshapes only (no transposes) ----
    xp = jnp.pad(x, ((0, 0), (0, 0), (1, 1), (1, 1)))                  # (N,Cin,Hp,Wp)
    zm = jnp.pad(xp.reshape(N, Cin, P), ((0, 0), (0, 0), (G, G)))      # (N,Cin,PM)

    # interior mask (zero on the padding ring) — makes the ring a valid zero
    # padding for the second conv.
    m2 = jnp.zeros((Hp, Wp), jnp.float32).at[1:H + 1, 1:W + 1].set(1.0)
    mask = m2.reshape(1, P)

    # 0/1 selection matrix gathering the output pixels (pool window origins
    # for the down path, all interior pixels for the up path).
    if down:
        ii = 2 * jnp.arange(Ho) + 1
        jj = 2 * jnp.arange(Wo) + 1
    else:
        ii = jnp.arange(Ho) + 1
        jj = jnp.arange(Wo) + 1
    q = (ii[:, None] * Wp + jj[None, :]).reshape(S)                    # flat pos
    sel = (jnp.arange(L)[:, None] == q[None, :]).astype(jnp.float32)   # (L, S)

    taps = [(kh - 1) * Wp + (kw - 1) for kh in range(3) for kw in range(3)]

    def kernel(z_ref, w1_ref, b1_ref, w2_ref, b2_ref, wr_ref,
               mask_ref, sel_ref, o_ref, a1m_ref):
        z = z_ref[...].astype(jnp.float32)                 # (Cin, PM)

        # conv1 (+ folded BN1) + ReLU over the whole padded plane
        acc1 = jnp.zeros((Cmid, P), jnp.float32)
        for t, d in enumerate(taps):
            acc1 = acc1 + jnp.dot(w1_ref[t], z[:, G + d:G + d + P],
                                  preferred_element_type=jnp.float32)
        a1 = jnp.maximum(acc1 + b1_ref[...], 0.0) * mask_ref[...]

        # re-embed with zero margins so conv2 taps are again static slices
        a1m_ref[...] = jnp.zeros((Cmid, PM), jnp.float32)
        a1m_ref[:, G:G + P] = a1
        a1m = a1m_ref[...]

        # conv2 (+ folded BN2) + ReLU
        acc2 = jnp.zeros((Cout, P), jnp.float32)
        for t, d in enumerate(taps):
            acc2 = acc2 + jnp.dot(w2_ref[t], a1m[:, G + d:G + d + P],
                                  preferred_element_type=jnp.float32)
        a2 = jnp.maximum(acc2 + b2_ref[...], 0.0)

        # 2x2 max-pool (down path) as max of 4 shifted slices
        if down:
            m = jnp.maximum(jnp.maximum(a2[:, 0:L], a2[:, 1:1 + L]),
                            jnp.maximum(a2[:, Wp:Wp + L],
                                        a2[:, Wp + 1:Wp + 1 + L]))
        else:
            m = a2[:, 0:L]

        selv = sel_ref[...]
        main = jnp.dot(m, selv, preferred_element_type=jnp.float32)    # (Cout,S)
        # residual 1x1 conv (stride 2 when down) on the same selected pixels
        zsel = jnp.dot(z[:, G:G + L], selv,
                       preferred_element_type=jnp.float32)             # (Cin, S)
        res = jnp.dot(wr_ref[...], zsel,
                      preferred_element_type=jnp.float32)              # (Cout,S)
        o_ref[...] = (main + res).astype(o_ref.dtype)

    full3 = lambda n: (0, 0, 0)
    full2 = lambda n: (0, 0)
    out = pl.pallas_call(
        kernel,
        out_shape=jax.ShapeDtypeStruct((N, Cout, S), x.dtype),
        grid_spec=pltpu.PrefetchScalarGridSpec(
            num_scalar_prefetch=0,
            grid=(N,),
            in_specs=[
                pl.BlockSpec((None, Cin, PM), lambda n: (n, 0, 0)),
                pl.BlockSpec((9, Cmid, Cin), full3),
                pl.BlockSpec((Cmid, 1), full2),
                pl.BlockSpec((9, Cout, Cmid), full3),
                pl.BlockSpec((Cout, 1), full2),
                pl.BlockSpec((Cout, Cin), full2),
                pl.BlockSpec((1, P), full2),
                pl.BlockSpec((L, S), full2),
            ],
            out_specs=pl.BlockSpec((None, Cout, S), lambda n: (n, 0, 0)),
            scratch_shapes=[pltpu.VMEM((Cmid, PM), jnp.float32)],
        ),
        compiler_params=pltpu.CompilerParams(
            dimension_semantics=("parallel",)),
    )(zm, w1s, b1c, w2s, b2c, wr2, mask, sel)

    # (N, Cout, Ho*Wo) -> NCHW, a free contiguous reshape (no transpose)
    return out.reshape(N, Cout, Ho, Wo)


def _reference(x, params, *, down=True, eps=1e-5):
    """Pure-JAX/XLA reference of the DoubleConv forward (eval-mode BN)."""
    dn = ("NCHW", "OIHW", "NCHW")
    hp = lax.Precision.HIGHEST

    def bn(y, g, b, m, v):
        g = g[None, :, None, None]; b = b[None, :, None, None]
        m = m[None, :, None, None]; v = v[None, :, None, None]
        return g * (y - m) / jnp.sqrt(v + eps) + b

    y = lax.conv_general_dilated(x, params["w1"], (1, 1), ((1, 1), (1, 1)),
                                 dimension_numbers=dn, precision=hp)
    y = jnp.maximum(bn(y, params["bn1_gamma"], params["bn1_beta"],
                       params["bn1_mean"], params["bn1_var"]), 0.0)
    y = lax.conv_general_dilated(y, params["w2"], (1, 1), ((1, 1), (1, 1)),
                                 dimension_numbers=dn, precision=hp)
    y = jnp.maximum(bn(y, params["bn2_gamma"], params["bn2_beta"],
                       params["bn2_mean"], params["bn2_var"]), 0.0)
    if down:
        y = lax.reduce_window(y, -jnp.inf, lax.max,
                              (1, 1, 2, 2), (1, 1, 2, 2), "VALID")
        r = lax.conv_general_dilated(x, params["wr"], (2, 2), "VALID",
                                     dimension_numbers=dn, precision=hp)
    else:
        r = lax.conv_general_dilated(x, params["wr"], (1, 1), "VALID",
                                     dimension_numbers=dn, precision=hp)
    return y + r


def make_params(key, in_channels, out_channels, mid_channels=None, down=True):
    mid = out_channels if down else (mid_channels or out_channels)
    ks = jax.random.split(key, 11)
    f32 = jnp.float32
    return {
        "w1": 0.3 * jax.random.normal(ks[0], (mid, in_channels, 3, 3), f32),
        "w2": 0.3 * jax.random.normal(ks[1], (out_channels, mid, 3, 3), f32),
        "wr": 0.3 * jax.random.normal(ks[2], (out_channels, in_channels, 1, 1), f32),
        "bn1_gamma": 1.0 + 0.1 * jax.random.normal(ks[3], (mid,), f32),
        "bn1_beta": 0.1 * jax.random.normal(ks[4], (mid,), f32),
        "bn1_mean": 0.1 * jax.random.normal(ks[5], (mid,), f32),
        "bn1_var": 1.0 + 0.1 * jax.random.uniform(ks[6], (mid,), f32),
        "bn2_gamma": 1.0 + 0.1 * jax.random.normal(ks[7], (out_channels,), f32),
        "bn2_beta": 0.1 * jax.random.normal(ks[8], (out_channels,), f32),
        "bn2_mean": 0.1 * jax.random.normal(ks[9], (out_channels,), f32),
        "bn2_var": 1.0 + 0.1 * jax.random.uniform(ks[10], (out_channels,), f32),
    }


if __name__ == "__main__":
    key = jax.random.PRNGKey(0)
    kx, kp1, kp2 = jax.random.split(key, 3)

    N, Cin, Cout, H, W = 2, 4, 8, 16, 16
    x = jax.random.normal(kx, (N, Cin, H, W), jnp.float32)

    # down path (default): (conv-bn-relu)x2 -> maxpool, residual 1x1 stride-2
    p_down = make_params(kp1, Cin, Cout, down=True)
    out_d = jax.block_until_ready(double_conv(x, p_down, down=True))
    ref_d = _reference(x, p_down, down=True)
    assert out_d.shape == (N, Cout, H // 2, W // 2)
    assert jnp.allclose(out_d, ref_d, atol=1e-2, rtol=1e-2), "down mismatch"

    # up path: (conv-bn-relu)x2 with mid channels, residual 1x1 stride-1
    p_up = make_params(kp2, Cin, Cout, mid_channels=6, down=False)
    out_u = jax.block_until_ready(double_conv(x, p_up, down=False))
    ref_u = _reference(x, p_up, down=False)
    assert out_u.shape == (N, Cout, H, W)
    assert jnp.allclose(out_u, ref_u, atol=1e-2, rtol=1e-2), "up mismatch"

    print("KERNEL_OK")
</pallas_src>

<mosaic_0001>
module attributes {stable_mosaic.version = 11 : i64} {
  func.func @kernel(%arg0: i32, %arg1: memref<1x4x362xf32, #tpu.memory_space<vmem>>, %arg2: memref<9x8x4xf32, #tpu.memory_space<vmem>>, %arg3: memref<8x1xf32, #tpu.memory_space<vmem>>, %arg4: memref<9x8x8xf32, #tpu.memory_space<vmem>>, %arg5: memref<8x1xf32, #tpu.memory_space<vmem>>, %arg6: memref<8x4xf32, #tpu.memory_space<vmem>>, %arg7: memref<1x324xf32, #tpu.memory_space<vmem>>, %arg8: memref<305x64xf32, #tpu.memory_space<vmem>>, %arg9: memref<1x8x64xf32, #tpu.memory_space<vmem>>, %arg10: memref<8x362xf32, #tpu.memory_space<vmem>>) attributes {dimension_semantics = [#tpu.dimension_semantics<parallel>], iteration_bounds = array<i64: 2>, scalar_prefetch = 0 : i64, scratch_operands = 1 : i64, tpu.core_type = #tpu.core_type<tc>, window_params = [{transform_indices = @transform_0, window_bounds = array<i64: 1, 4, 362>}, {pipeline_mode = #tpu.pipeline_mode<synchronous>, transform_indices = @transform_1, window_bounds = array<i64: 9, 8, 4>}, {pipeline_mode = #tpu.pipeline_mode<synchronous>, transform_indices = @transform_2, window_bounds = array<i64: 8, 1>}, {pipeline_mode = #tpu.pipeline_mode<synchronous>, transform_indices = @transform_3, window_bounds = array<i64: 9, 8, 8>}, {pipeline_mode = #tpu.pipeline_mode<synchronous>, transform_indices = @transform_4, window_bounds = array<i64: 8, 1>}, {pipeline_mode = #tpu.pipeline_mode<synchronous>, transform_indices = @transform_5, window_bounds = array<i64: 8, 4>}, {pipeline_mode = #tpu.pipeline_mode<synchronous>, transform_indices = @transform_6, window_bounds = array<i64: 1, 324>}, {pipeline_mode = #tpu.pipeline_mode<synchronous>, transform_indices = @transform_7, window_bounds = array<i64: 305, 64>}, {transform_indices = @transform_8, window_bounds = array<i64: 1, 8, 64>}]} {
    %c0 = arith.constant 0 : index
    %c0_0 = arith.constant 0 : index
    %c0_1 = arith.constant 0 : index
    %0 = vector.load %arg1[%c0, %c0_0, %c0_1] : memref<1x4x362xf32, #tpu.memory_space<vmem>>, vector<1x4x362xf32>
    %1 = vector.shape_cast %0 : vector<1x4x362xf32> to vector<4x362xf32>
    %cst = arith.constant 0.000000e+00 : f32
    %2 = vector.broadcast %cst : f32 to vector<8x324xf32>
    %c0_2 = arith.constant 0 : index
    %c0_3 = arith.constant 0 : index
    %c0_4 = arith.constant 0 : index
    %3 = vector.load %arg2[%c0_2, %c0_3, %c0_4] : memref<9x8x4xf32, #tpu.memory_space<vmem>>, vector<1x8x4xf32>
    %4 = vector.shape_cast %3 : vector<1x8x4xf32> to vector<8x4xf32>
    %5 = vector.extract_strided_slice %1 {offsets = [0, 0], sizes = [4, 324], strides = [1, 1]} : vector<4x362xf32> to vector<4x324xf32>
    %cst_5 = arith.constant dense<0.000000e+00> : vector<8x324xf32>
    %6 = tpu.matmul %4, %5, %cst_5 {dimension_numbers = #tpu.dot_dimension_numbers<[1], [0], [0], [1], [0, 0, 1, 1], [], []>} : vector<8x4xf32>, vector<4x324xf32>, vector<8x324xf32> -> vector<8x324xf32>
    %7 = arith.addf %2, %6 : vector<8x324xf32>
    %c1 = arith.constant 1 : index
    %c0_6 = arith.constant 0 : index
    %c0_7 = arith.constant 0 : index
    %8 = vector.load %arg2[%c1, %c0_6, %c0_7] : memref<9x8x4xf32, #tpu.memory_space<vmem>>, vector<1x8x4xf32>
    %9 = vector.shape_cast %8 : vector<1x8x4xf32> to vector<8x4xf32>
    %10 = vector.extract_strided_slice %1 {offsets = [0, 1], sizes = [4, 324], strides = [1, 1]} : vector<4x362xf32> to vector<4x324xf32>
    %cst_8 = arith.constant dense<0.000000e+00> : vector<8x324xf32>
    %11 = tpu.matmul %9, %10, %cst_8 {dimension_numbers = #tpu.dot_dimension_numbers<[1], [0], [0], [1], [0, 0, 1, 1], [], []>} : vector<8x4xf32>, vector<4x324xf32>, vector<8x324xf32> -> vector<8x324xf32>
    %12 = arith.addf %7, %11 : vector<8x324xf32>
    %c2 = arith.constant 2 : index
    %c0_9 = arith.constant 0 : index
    %c0_10 = arith.constant 0 : index
    %13 = vector.load %arg2[%c2, %c0_9, %c0_10] : memref<9x8x4xf32, #tpu.memory_space<vmem>>, vector<1x8x4xf32>
    %14 = vector.shape_cast %13 : vector<1x8x4xf32> to vector<8x4xf32>
    %15 = vector.extract_strided_slice %1 {offsets = [0, 2], sizes = [4, 324], strides = [1, 1]} : vector<4x362xf32> to vector<4x324xf32>
    %cst_11 = arith.constant dense<0.000000e+00> : vector<8x324xf32>
    %16 = tpu.matmul %14, %15, %cst_11 {dimension_numbers = #tpu.dot_dimension_numbers<[1], [0], [0], [1], [0, 0, 1, 1], [], []>} : vector<8x4xf32>, vector<4x324xf32>, vector<8x324xf32> -> vector<8x324xf32>
    %17 = arith.addf %12, %16 : vector<8x324xf32>
    %c3 = arith.constant 3 : index
    %c0_12 = arith.constant 0 : index
    %c0_13 = arith.constant 0 : index
    %18 = vector.load %arg2[%c3, %c0_12, %c0_13] : memref<9x8x4xf32, #tpu.memory_space<vmem>>, vector<1x8x4xf32>
    %19 = vector.shape_cast %18 : vector<1x8x4xf32> to vector<8x4xf32>
    %20 = vector.extract_strided_slice %1 {offsets = [0, 18], sizes = [4, 324], strides = [1, 1]} : vector<4x362xf32> to vector<4x324xf32>
    %cst_14 = arith.constant dense<0.000000e+00> : vector<8x324xf32>
    %21 = tpu.matmul %19, %20, %cst_14 {dimension_numbers = #tpu.dot_dimension_numbers<[1], [0], [0], [1], [0, 0, 1, 1], [], []>} : vector<8x4xf32>, vector<4x324xf32>, vector<8x324xf32> -> vector<8x324xf32>
    %22 = arith.addf %17, %21 : vector<8x324xf32>
    %c4 = arith.constant 4 : index
    %c0_15 = arith.constant 0 : index
    %c0_16 = arith.constant 0 : index
    %23 = vector.load %arg2[%c4, %c0_15, %c0_16] : memref<9x8x4xf32, #tpu.memory_space<vmem>>, vector<1x8x4xf32>
    %24 = vector.shape_cast %23 : vector<1x8x4xf32> to vector<8x4xf32>
    %25 = vector.extract_strided_slice %1 {offsets = [0, 19], sizes = [4, 324], strides = [1, 1]} : vector<4x362xf32> to vector<4x324xf32>
    %cst_17 = arith.constant dense<0.000000e+00> : vector<8x324xf32>
    %26 = tpu.matmul %24, %25, %cst_17 {dimension_numbers = #tpu.dot_dimension_numbers<[1], [0], [0], [1], [0, 0, 1, 1], [], []>} : vector<8x4xf32>, vector<4x324xf32>, vector<8x324xf32> -> vector<8x324xf32>
    %27 = arith.addf %22, %26 : vector<8x324xf32>
    %c5 = arith.constant 5 : index
    %c0_18 = arith.constant 0 : index
    %c0_19 = arith.constant 0 : index
    %28 = vector.load %arg2[%c5, %c0_18, %c0_19] : memref<9x8x4xf32, #tpu.memory_space<vmem>>, vector<1x8x4xf32>
    %29 = vector.shape_cast %28 : vector<1x8x4xf32> to vector<8x4xf32>
    %30 = vector.extract_strided_slice %1 {offsets = [0, 20], sizes = [4, 324], strides = [1, 1]} : vector<4x362xf32> to vector<4x324xf32>
    %cst_20 = arith.constant dense<0.000000e+00> : vector<8x324xf32>
    %31 = tpu.matmul %29, %30, %cst_20 {dimension_numbers = #tpu.dot_dimension_numbers<[1], [0], [0], [1], [0, 0, 1, 1], [], []>} : vector<8x4xf32>, vector<4x324xf32>, vector<8x324xf32> -> vector<8x324xf32>
    %32 = arith.addf %27, %31 : vector<8x324xf32>
    %c6 = arith.constant 6 : index
    %c0_21 = arith.constant 0 : index
    %c0_22 = arith.constant 0 : index
    %33 = vector.load %arg2[%c6, %c0_21, %c0_22] : memref<9x8x4xf32, #tpu.memory_space<vmem>>, vector<1x8x4xf32>
    %34 = vector.shape_cast %33 : vector<1x8x4xf32> to vector<8x4xf32>
    %35 = vector.extract_strided_slice %1 {offsets = [0, 36], sizes = [4, 324], strides = [1, 1]} : vector<4x362xf32> to vector<4x324xf32>
    %cst_23 = arith.constant dense<0.000000e+00> : vector<8x324xf32>
    %36 = tpu.matmul %34, %35, %cst_23 {dimension_numbers = #tpu.dot_dimension_numbers<[1], [0], [0], [1], [0, 0, 1, 1], [], []>} : vector<8x4xf32>, vector<4x324xf32>, vector<8x324xf32> -> vector<8x324xf32>
    %37 = arith.addf %32, %36 : vector<8x324xf32>
    %c7 = arith.constant 7 : index
    %c0_24 = arith.constant 0 : index
    %c0_25 = arith.constant 0 : index
    %38 = vector.load %arg2[%c7, %c0_24, %c0_25] : memref<9x8x4xf32, #tpu.memory_space<vmem>>, vector<1x8x4xf32>
    %39 = vector.shape_cast %38 : vector<1x8x4xf32> to vector<8x4xf32>
    %40 = vector.extract_strided_slice %1 {offsets = [0, 37], sizes = [4, 324], strides = [1, 1]} : vector<4x362xf32> to vector<4x324xf32>
    %cst_26 = arith.constant dense<0.000000e+00> : vector<8x324xf32>
    %41 = tpu.matmul %39, %40, %cst_26 {dimension_numbers = #tpu.dot_dimension_numbers<[1], [0], [0], [1], [0, 0, 1, 1], [], []>} : vector<8x4xf32>, vector<4x324xf32>, vector<8x324xf32> -> vector<8x324xf32>
    %42 = arith.addf %37, %41 : vector<8x324xf32>
    %c8 = arith.constant 8 : index
    %c0_27 = arith.constant 0 : index
    %c0_28 = arith.constant 0 : index
    %43 = vector.load %arg2[%c8, %c0_27, %c0_28] : memref<9x8x4xf32, #tpu.memory_space<vmem>>, vector<1x8x4xf32>
    %44 = vector.shape_cast %43 : vector<1x8x4xf32> to vector<8x4xf32>
    %45 = vector.extract_strided_slice %1 {offsets = [0, 38], sizes = [4, 324], strides = [1, 1]} : vector<4x362xf32> to vector<4x324xf32>
    %cst_29 = arith.constant dense<0.000000e+00> : vector<8x324xf32>
    %46 = tpu.matmul %44, %45, %cst_29 {dimension_numbers = #tpu.dot_dimension_numbers<[1], [0], [0], [1], [0, 0, 1, 1], [], []>} : vector<8x4xf32>, vector<4x324xf32>, vector<8x324xf32> -> vector<8x324xf32>
    %47 = arith.addf %42, %46 : vector<8x324xf32>
    %c0_30 = arith.constant 0 : index
    %c0_31 = arith.constant 0 : index
    %48 = vector.load %arg3[%c0_30, %c0_31] : memref<8x1xf32, #tpu.memory_space<vmem>>, vector<8x1xf32>
    %49 = vector.broadcast %48 : vector<8x1xf32> to vector<8x324xf32>
    %50 = arith.addf %47, %49 : vector<8x324xf32>
    %cst_32 = arith.constant 0.000000e+00 : f32
    %51 = vector.broadcast %cst_32 : f32 to vector<8x324xf32>
    %52 = arith.maximumf %50, %51 : vector<8x324xf32>
    %c0_33 = arith.constant 0 : index
    %c0_34 = arith.constant 0 : index
    %53 = vector.load %arg7[%c0_33, %c0_34] : memref<1x324xf32, #tpu.memory_space<vmem>>, vector<1x324xf32>
    %54 = vector.broadcast %53 : vector<1x324xf32> to vector<8x324xf32>
    %55 = arith.mulf %52, %54 : vector<8x324xf32>
    %cst_35 = arith.constant 0.000000e+00 : f32
    %56 = vector.broadcast %cst_35 : f32 to vector<8x362xf32>
    %c0_36 = arith.constant 0 : index
    %c0_37 = arith.constant 0 : index
    %57 = vector.load %arg10[%c0_36, %c0_37] : memref<8x362xf32, #tpu.memory_space<vmem>>, vector<8x362xf32>
    tpu.vector_store %arg10[%c0_36, %c0_37], %56 {strides = array<i32>} : memref<8x362xf32, #tpu.memory_space<vmem>>, vector<8x362xf32>,
    %c0_38 = arith.constant 0 : index
    %c19 = arith.constant 19 : index
    %58 = vector.load %arg10[%c0_38, %c19] : memref<8x362xf32, #tpu.memory_space<vmem>>, vector<8x324xf32>
    tpu.vector_store %arg10[%c0_38, %c19], %55 {strides = array<i32>} : memref<8x362xf32, #tpu.memory_space<vmem>>, vector<8x324xf32>,
    %c0_39 = arith.constant 0 : index
    %c0_40 = arith.constant 0 : index
    %59 = vector.load %arg10[%c0_39, %c0_40] : memref<8x362xf32, #tpu.memory_space<vmem>>, vector<8x362xf32>
    %cst_41 = arith.constant 0.000000e+00 : f32
    %60 = vector.broadcast %cst_41 : f32 to vector<8x324xf32>
    %c0_42 = arith.constant 0 : index
    %c0_43 = arith.constant 0 : index
    %c0_44 = arith.constant 0 : index
    %61 = vector.load %arg4[%c0_42, %c0_43, %c0_44] : memref<9x8x8xf32, #tpu.memory_space<vmem>>, vector<1x8x8xf32>
    %62 = vector.shape_cast %61 : vector<1x8x8xf32> to vector<8x8xf32>
    %63 = vector.extract_strided_slice %59 {offsets = [0, 0], sizes = [8, 324], strides = [1, 1]} : vector<8x362xf32> to vector<8x324xf32>
    %cst_45 = arith.constant dense<0.000000e+00> : vector<8x324xf32>
    %64 = tpu.matmul %62, %63, %cst_45 {dimension_numbers = #tpu.dot_dimension_numbers<[1], [0], [0], [1], [0, 0, 1, 1], [], []>} : vector<8x8xf32>, vector<8x324xf32>, vector<8x324xf32> -> vector<8x324xf32>
    %65 = arith.addf %60, %64 : vector<8x324xf32>
    %c1_46 = arith.constant 1 : index
    %c0_47 = arith.constant 0 : index
    %c0_48 = arith.constant 0 : index
    %66 = vector.load %arg4[%c1_46, %c0_47, %c0_48] : memref<9x8x8xf32, #tpu.memory_space<vmem>>, vector<1x8x8xf32>
    %67 = vector.shape_cast %66 : vector<1x8x8xf32> to vector<8x8xf32>
    %68 = vector.extract_strided_slice %59 {offsets = [0, 1], sizes = [8, 324], strides = [1, 1]} : vector<8x362xf32> to vector<8x324xf32>
    %cst_49 = arith.constant dense<0.000000e+00> : vector<8x324xf32>
    %69 = tpu.matmul %67, %68, %cst_49 {dimension_numbers = #tpu.dot_dimension_numbers<[1], [0], [0], [1], [0, 0, 1, 1], [], []>} : vector<8x8xf32>, vector<8x324xf32>, vector<8x324xf32> -> vector<8x324xf32>
    %70 = arith.addf %65, %69 : vector<8x324xf32>
    %c2_50 = arith.constant 2 : index
    %c0_51 = arith.constant 0 : index
    %c0_52 = arith.constant 0 : index
    %71 = vector.load %arg4[%c2_50, %c0_51, %c0_52] : memref<9x8x8xf32, #tpu.memory_space<vmem>>, vector<1x8x8xf32>
    %72 = vector.shape_cast %71 : vector<1x8x8xf32> to vector<8x8xf32>
    %73 = vector.extract_strided_slice %59 {offsets = [0, 2], sizes = [8, 324], strides = [1, 1]} : vector<8x362xf32> to vector<8x324xf32>
    %cst_53 = arith.constant dense<0.000000e+00> : vector<8x324xf32>
    %74 = tpu.matmul %72, %73, %cst_53 {dimension_numbers = #tpu.dot_dimension_numbers<[1], [0], [0], [1], [0, 0, 1, 1], [], []>} : vector<8x8xf32>, vector<8x324xf32>, vector<8x324xf32> -> vector<8x324xf32>
    %75 = arith.addf %70, %74 : vector<8x324xf32>
    %c3_54 = arith.constant 3 : index
    %c0_55 = arith.constant 0 : index
    %c0_56 = arith.constant 0 : index
    %76 = vector.load %arg4[%c3_54, %c0_55, %c0_56] : memref<9x8x8xf32, #tpu.memory_space<vmem>>, vector<1x8x8xf32>
    %77 = vector.shape_cast %76 : vector<1x8x8xf32> to vector<8x8xf32>
    %78 = vector.extract_strided_slice %59 {offsets = [0, 18], sizes = [8, 324], strides = [1, 1]} : vector<8x362xf32> to vector<8x324xf32>
    %cst_57 = arith.constant dense<0.000000e+00> : vector<8x324xf32>
    %79 = tpu.matmul %77, %78, %cst_57 {dimension_numbers = #tpu.dot_dimension_numbers<[1], [0], [0], [1], [0, 0, 1, 1], [], []>} : vector<8x8xf32>, vector<8x324xf32>, vector<8x324xf32> -> vector<8x324xf32>
    %80 = arith.addf %75, %79 : vector<8x324xf32>
    %c4_58 = arith.constant 4 : index
    %c0_59 = arith.constant 0 : index
    %c0_60 = arith.constant 0 : index
    %81 = vector.load %arg4[%c4_58, %c0_59, %c0_60] : memref<9x8x8xf32, #tpu.memory_space<vmem>>, vector<1x8x8xf32>
    %82 = vector.shape_cast %81 : vector<1x8x8xf32> to vector<8x8xf32>
    %83 = vector.extract_strided_slice %59 {offsets = [0, 19], sizes = [8, 324], strides = [1, 1]} : vector<8x362xf32> to vector<8x324xf32>
    %cst_61 = arith.constant dense<0.000000e+00> : vector<8x324xf32>
    %84 = tpu.matmul %82, %83, %cst_61 {dimension_numbers = #tpu.dot_dimension_numbers<[1], [0], [0], [1], [0, 0, 1, 1], [], []>} : vector<8x8xf32>, vector<8x324xf32>, vector<8x324xf32> -> vector<8x324xf32>
    %85 = arith.addf %80, %84 : vector<8x324xf32>
    %c5_62 = arith.constant 5 : index
    %c0_63 = arith.constant 0 : index
    %c0_64 = arith.constant 0 : index
    %86 = vector.load %arg4[%c5_62, %c0_63, %c0_64] : memref<9x8x8xf32, #tpu.memory_space<vmem>>, vector<1x8x8xf32>
    %87 = vector.shape_cast %86 : vector<1x8x8xf32> to vector<8x8xf32>
    %88 = vector.extract_strided_slice %59 {offsets = [0, 20], sizes = [8, 324], strides = [1, 1]} : vector<8x362xf32> to vector<8x324xf32>
    %cst_65 = arith.constant dense<0.000000e+00> : vector<8x324xf32>
    %89 = tpu.matmul %87, %88, %cst_65 {dimension_numbers = #tpu.dot_dimension_numbers<[1], [0], [0], [1], [0, 0, 1, 1], [], []>} : vector<8x8xf32>, vector<8x324xf32>, vector<8x324xf32> -> vector<8x324xf32>
    %90 = arith.addf %85, %89 : vector<8x324xf32>
    %c6_66 = arith.constant 6 : index
    %c0_67 = arith.constant 0 : index
    %c0_68 = arith.constant 0 : index
    %91 = vector.load %arg4[%c6_66, %c0_67, %c0_68] : memref<9x8x8xf32, #tpu.memory_space<vmem>>, vector<1x8x8xf32>
    %92 = vector.shape_cast %91 : vector<1x8x8xf32> to vector<8x8xf32>
    %93 = vector.extract_strided_slice %59 {offsets = [0, 36], sizes = [8, 324], strides = [1, 1]} : vector<8x362xf32> to vector<8x324xf32>
    %cst_69 = arith.constant dense<0.000000e+00> : vector<8x324xf32>
    %94 = tpu.matmul %92, %93, %cst_69 {dimension_numbers = #tpu.dot_dimension_numbers<[1], [0], [0], [1], [0, 0, 1, 1], [], []>} : vector<8x8xf32>, vector<8x324xf32>, vector<8x324xf32> -> vector<8x324xf32>
    %95 = arith.addf %90, %94 : vector<8x324xf32>
    %c7_70 = arith.constant 7 : index
    %c0_71 = arith.constant 0 : index
    %c0_72 = arith.constant 0 : index
    %96 = vector.load %arg4[%c7_70, %c0_71, %c0_72] : memref<9x8x8xf32, #tpu.memory_space<vmem>>, vector<1x8x8xf32>
    %97 = vector.shape_cast %96 : vector<1x8x8xf32> to vector<8x8xf32>
    %98 = vector.extract_strided_slice %59 {offsets = [0, 37], sizes = [8, 324], strides = [1, 1]} : vector<8x362xf32> to vector<8x324xf32>
    %cst_73 = arith.constant dense<0.000000e+00> : vector<8x324xf32>
    %99 = tpu.matmul %97, %98, %cst_73 {dimension_numbers = #tpu.dot_dimension_numbers<[1], [0], [0], [1], [0, 0, 1, 1], [], []>} : vector<8x8xf32>, vector<8x324xf32>, vector<8x324xf32> -> vector<8x324xf32>
    %100 = arith.addf %95, %99 : vector<8x324xf32>
    %c8_74 = arith.constant 8 : index
    %c0_75 = arith.constant 0 : index
    %c0_76 = arith.constant 0 : index
    %101 = vector.load %arg4[%c8_74, %c0_75, %c0_76] : memref<9x8x8xf32, #tpu.memory_space<vmem>>, vector<1x8x8xf32>
    %102 = vector.shape_cast %101 : vector<1x8x8xf32> to vector<8x8xf32>
    %103 = vector.extract_strided_slice %59 {offsets = [0, 38], sizes = [8, 324], strides = [1, 1]} : vector<8x362xf32> to vector<8x324xf32>
    %cst_77 = arith.constant dense<0.000000e+00> : vector<8x324xf32>
    %104 = tpu.matmul %102, %103, %cst_77 {dimension_numbers = #tpu.dot_dimension_numbers<[1], [0], [0], [1], [0, 0, 1, 1], [], []>} : vector<8x8xf32>, vector<8x324xf32>, vector<8x324xf32> -> vector<8x324xf32>
    %105 = arith.addf %100, %104 : vector<8x324xf32>
    %c0_78 = arith.constant 0 : index
    %c0_79 = arith.constant 0 : index
    %106 = vector.load %arg5[%c0_78, %c0_79] : memref<8x1xf32, #tpu.memory_space<vmem>>, vector<8x1xf32>
    %107 = vector.broadcast %106 : vector<8x1xf32> to vector<8x324xf32>
    %108 = arith.addf %105, %107 : vector<8x324xf32>
    %cst_80 = arith.constant 0.000000e+00 : f32
    %109 = vector.broadcast %cst_80 : f32 to vector<8x324xf32>
    %110 = arith.maximumf %108, %109 : vector<8x324xf32>
    %111 = vector.extract_strided_slice %110 {offsets = [0, 0], sizes = [8, 305], strides = [1, 1]} : vector<8x324xf32> to vector<8x305xf32>
    %112 = vector.extract_strided_slice %110 {offsets = [0, 1], sizes = [8, 305], strides = [1, 1]} : vector<8x324xf32> to vector<8x305xf32>
    %113 = arith.maximumf %111, %112 : vector<8x305xf32>
    %114 = vector.extract_strided_slice %110 {offsets = [0, 18], sizes = [8, 305], strides = [1, 1]} : vector<8x324xf32> to vector<8x305xf32>
    %115 = vector.extract_strided_slice %110 {offsets = [0, 19], sizes = [8, 305], strides = [1, 1]} : vector<8x324xf32> to vector<8x305xf32>
    %116 = arith.maximumf %114, %115 : vector<8x305xf32>
    %117 = arith.maximumf %113, %116 : vector<8x305xf32>
    %c0_81 = arith.constant 0 : index
    %c0_82 = arith.constant 0 : index
    %118 = vector.load %arg8[%c0_81, %c0_82] : memref<305x64xf32, #tpu.memory_space<vmem>>, vector<305x64xf32>
    %cst_83 = arith.constant dense<0.000000e+00> : vector<8x64xf32>
    %119 = tpu.matmul %117, %118, %cst_83 {dimension_numbers = #tpu.dot_dimension_numbers<[1], [0], [0], [1], [0, 0, 1, 1], [], []>} : vector<8x305xf32>, vector<305x64xf32>, vector<8x64xf32> -> vector<8x64xf32>
    %120 = vector.extract_strided_slice %1 {offsets = [0, 19], sizes = [4, 305], strides = [1, 1]} : vector<4x362xf32> to vector<4x305xf32>
    %cst_84 = arith.constant dense<0.000000e+00> : vector<4x64xf32>
    %121 = tpu.matmul %120, %118, %cst_84 {dimension_numbers = #tpu.dot_dimension_numbers<[1], [0], [0], [1], [0, 0, 1, 1], [], []>} : vector<4x305xf32>, vector<305x64xf32>, vector<4x64xf32> -> vector<4x64xf32>
    %c0_85 = arith.constant 0 : index
    %c0_86 = arith.constant 0 : index
    %122 = vector.load %arg6[%c0_85, %c0_86] : memref<8x4xf32, #tpu.memory_space<vmem>>, vector<8x4xf32>
    %cst_87 = arith.constant dense<0.000000e+00> : vector<8x64xf32>
    %123 = tpu.matmul %122, %121, %cst_87 {dimension_numbers = #tpu.dot_dimension_numbers<[1], [0], [0], [1], [0, 0, 1, 1], [], []>} : vector<8x4xf32>, vector<4x64xf32>, vector<8x64xf32> -> vector<8x64xf32>
    %124 = arith.addf %119, %123 : vector<8x64xf32>
    %c0_88 = arith.constant 0 : index
    %c0_89 = arith.constant 0 : index
    %c0_90 = arith.constant 0 : index
    %125 = vector.load %arg9[%c0_88, %c0_89, %c0_90] : memref<1x8x64xf32, #tpu.memory_space<vmem>>, vector<1x8x64xf32>
    %126 = vector.shape_cast %125 : vector<1x8x64xf32> to vector<8x64xf32>
    %127 = vector.shape_cast %124 : vector<8x64xf32> to vector<1x8x64xf32>
    tpu.vector_store %arg9[%c0_88, %c0_89, %c0_90], %127 {strides = array<i32>} : memref<1x8x64xf32, #tpu.memory_space<vmem>>, vector<1x8x64xf32>,
    return
  }
  func.func @transform_0(%arg0: i32) -> (i32, i32, i32) {
    %c0_i32 = arith.constant 0 : i32
    %c0_i32_0 = arith.constant 0 : i32
    %c0_i32_1 = arith.constant 0 : i32
    return %arg0, %c0_i32, %c0_i32_0 : i32, i32, i32
  }
  func.func @transform_1(%arg0: i32) -> (i32, i32, i32) {
    %c0_i32 = arith.constant 0 : i32
    %c0_i32_0 = arith.constant 0 : i32
    %c0_i32_1 = arith.constant 0 : i32
    %c0_i32_2 = arith.constant 0 : i32
    return %c0_i32, %c0_i32_0, %c0_i32_1 : i32, i32, i32
  }
  func.func @transform_2(%arg0: i32) -> (i32, i32) {
    %c0_i32 = arith.constant 0 : i32
    %c0_i32_0 = arith.constant 0 : i32
    %c0_i32_1 = arith.constant 0 : i32
    return %c0_i32, %c0_i32_0 : i32, i32
  }
  func.func @transform_3(%arg0: i32) -> (i32, i32, i32) {
    %c0_i32 = arith.constant 0 : i32
    %c0_i32_0 = arith.constant 0 : i32
    %c0_i32_1 = arith.constant 0 : i32
    %c0_i32_2 = arith.constant 0 : i32
    return %c0_i32, %c0_i32_0, %c0_i32_1 : i32, i32, i32
  }
  func.func @transform_4(%arg0: i32) -> (i32, i32) {
    %c0_i32 = arith.constant 0 : i32
    %c0_i32_0 = arith.constant 0 : i32
    %c0_i32_1 = arith.constant 0 : i32
    return %c0_i32, %c0_i32_0 : i32, i32
  }
  func.func @transform_5(%arg0: i32) -> (i32, i32) {
    %c0_i32 = arith.constant 0 : i32
    %c0_i32_0 = arith.constant 0 : i32
    %c0_i32_1 = arith.constant 0 : i32
    return %c0_i32, %c0_i32_0 : i32, i32
  }
  func.func @transform_6(%arg0: i32) -> (i32, i32) {
    %c0_i32 = arith.constant 0 : i32
    %c0_i32_0 = arith.constant 0 : i32
    %c0_i32_1 = arith.constant 0 : i32
    return %c0_i32, %c0_i32_0 : i32, i32
  }
  func.func @transform_7(%arg0: i32) -> (i32, i32) {
    %c0_i32 = arith.constant 0 : i32
    %c0_i32_0 = arith.constant 0 : i32
    %c0_i32_1 = arith.constant 0 : i32
    return %c0_i32, %c0_i32_0 : i32, i32
  }
  func.func @transform_8(%arg0: i32) -> (i32, i32, i32) {
    %c0_i32 = arith.constant 0 : i32
    %c0_i32_0 = arith.constant 0 : i32
    %c0_i32_1 = arith.constant 0 : i32
    return %arg0, %c0_i32, %c0_i32_0 : i32, i32, i32
  }
}

</mosaic_0001>

<bundles_post_ra>
// kernel: tpu_custom_call.1
= control target key start
LH: loop header
LB: loop body
LE: loop exit
PB: predicated region body
PF: predicated region fallthrough
CT: control target
= control target key end

     0   :  { %13 = vsyncpa [#allocation4], 0  ;;  %s5061_s0 = inlined_call_operand.vmem [shape: f32[2,4,362], index: 0, kind: input, shape index: {}]   ;;  %s5062_s1 = inlined_call_operand.vmem [shape: f32[9,8,4], index: 1, kind: input, shape index: {}]   ;;  %s5063_s2 = inlined_call_operand.vmem [shape: f32[8,1], index: 2, kind: input, shape index: {}]   ;;  %s5064_s3 = inlined_call_operand.vmem [shape: f32[9,8,8], index: 3, kind: input, shape index: {}]   ;;  %s5065_s4 = inlined_call_operand.vmem [shape: f32[8,1], index: 4, kind: input, shape index: {}]   ;;  %s5066_s5 = inlined_call_operand.vmem [shape: f32[8,4], index: 5, kind: input, shape index: {}]   ;;  %s5067_s6 = inlined_call_operand.vmem [shape: f32[1,324], index: 6, kind: input, shape index: {}]   ;;  %s5068_s7 = inlined_call_operand.vmem [shape: f32[305,64], index: 7, kind: input, shape index: {}]   ;;  %s5069_s8 = inlined_call_operand.hbm [shape: f32[2,8,64], index: 8, kind: output, shape index: {}]  }
   0x1   :  { %15 = vsyncpa [#allocation4 + $0x1], 0  ;;  %s4439_s27 = smov 0   ;;  %s4441_s28 = smov 0  }
   0x2   :  { %s4443_s29 = smov 0   ;;  %s4445_s30 = smov 0  }
   0x3 LB: > { %s4460_s9 = sadd.s32 4294967295, %s4378_s30   ;;  %s3785_s10 = sadd.s32 4294967294, %s4378_s30   ;;  %s4378_s30 = sphi %s4445_s30, %s5075_s30   ;;  %s4374_s29 = sphi %s4443_s29, %s5074_s29   ;;  %s4370_s28 = sphi %s4441_s28, %s5073_s28   ;;  %s4366_s27 = sphi %s4439_s27, %s5072_s27  }
   0x4   : > { %s4464_s11 = sadd.s32 1, %s4378_s30   ;;  %s201_s12 = sadd.s32 1, %s4374_s29 }
   0x5   : > { %s198_s13 = ssub.s32 %s4378_s30, %s4464_s11  ;;  %p211_p0 = scmp.ne.s32.totalorder %s4374_s29, %s4370_s28 }
   0x6   : > { %p199_p1 = scmp.eq.s32.totalorder %s198_s13, 0  ;;  %p212_p2 = scmp.eq.s32.totalorder %s4460_s9, 1 }
   0x7   : > { %p217_p3 = scmp.ne.s32.totalorder %s4370_s28, %s4366_s27  ;;  %p218_p4 = scmp.eq.s32.totalorder %s3785_s10, 1 }
   0x8   : > { %s4475_s14 = scalar_select %p199_p1, %s4374_s29, %s201_s12  }
   0x9   : > { %p4477_p5 = por %p212_p2, %p211_p0  ;;  %p4481_p6 = por %p218_p4, %p217_p3 }
   0xa   : > { %p3788_p7 = scmp.ge.s32.totalorder %s4378_s30, 1  ;;  %p265_p8 = scmp.lt.s32.totalorder %s4378_s30, 3 }
   0xc   : > { %p266_p9 = pnand %p3788_p7, %p265_p8 }
   0xd   : > { %p299_p10 = scmp.lt.s32.totalorder (!%p266_p9), %s4460_s9, 1  ;;  %v4380_v0 = vmov (!%p266_p9), 0.0   ;;  %vm4381_vm0 = vmmov (!%p266_p9), 0   ;;  %s4382_s22 = smov (!%p266_p9), 127   ;;  %v1771_v4 = vld [vmem:[%s5063_s2] sm:$0xff] (!%p266_p9)  ;;  %v4390_v5 = vmov (!%p266_p9), 0  }
   0xe   : > { %269 = sbr.rel (%p266_p9) target bundleno = 1447 (0x5a7), region = 52  ;;  %4004 = vmatprep.subr.mxu1 (!%p266_p9), %v4380_v0  ;;  %1803 = vst [vmem:[#allocation2] sm:$0xff] (!%p266_p9), %v4380_v0  ;;  %396 = vmatprep.mubr.f32.mxu0 (!%p266_p9), %v4380_v0  ;;  %s4383_s23 = smov (!%p266_p9), 126   ;;  %vm325_vm1 = vcmask (!%p266_p9), 1043456   ;;  %vm318_vm2 = vcmask (!%p266_p9), 1039360   ;;  %v3791_v11 = vld [vmem:[%s5062_s1 + $0x8] sm:$0xff] (!%p266_p9) }
   0xf   : > { %4006 = vmatprep.mubr.msk.f32.mxu1 (!%p266_p9), %vm4381_vm0, %v4380_v0  ;;  %s4384_s24 = smov (!%p266_p9), 110   ;;  %s4385_s25 = smov (!%p266_p9), 109   ;;  %4303 = vset.pattern.permute.xlu0 (!%p266_p9), %v4390_v5  ;;  %vm321_vm3 = vcmask (!%p266_p9), 31744   ;;  %vm631_vm4 = vcmask (!%p266_p9), 1031168   ;;  %v306_v17 = vld [vmem:[%s5062_s1] sm:$0xff] (!%p266_p9)  ;;  %vm795_vm5 = vcmask (!%p266_p9), 900096  }
  0x10   : > { %s4386_s26 = smov (!%p266_p9), 108   ;;  %s4387_s10 = smov (!%p266_p9), 92   ;;  %4304 = vset.pattern.permute.xlu1 (!%p266_p9), %v4390_v5  ;;  %v3802_v22 = vld [vmem:[%s5062_s1 + $0x10] sm:$0xff] (!%p266_p9)  ;;  %v3808_v25 = vld [vmem:[%s5062_s1 + $0x18] sm:$0xff] (!%p266_p9)  ;;  %vm959_vm6 = vcmask (!%p266_p9), 891904   ;;  %v3814_v27 = vld [vmem:[%s5062_s1 + $0x20] sm:$0xff] (!%p266_p9) }
  0x11   : > { %s4388_s12 = smov (!%p266_p9), 91   ;;  %s4389_s13 = smov (!%p266_p9), 90   ;;  %v3820_v32 = vld [vmem:[%s5062_s1 + $0x28] sm:$0xff] (!%p266_p9)  ;;  %vm1123_vm7 = vcmask (!%p266_p9), 883712   ;;  %v3826_v39 = vld [vmem:[%s5062_s1 + $0x30] sm:$0xff] (!%p266_p9)  ;;  %vm1287_vm8 = vcmask (!%p266_p9), 752640  }
  0x12   : > { %v3832_v42 = vld [vmem:[%s5062_s1 + $0x38] sm:$0xff] (!%p266_p9)  ;;  %v3838_v46 = vld [vmem:[%s5062_s1 + $0x40] sm:$0xff] (!%p266_p9)  ;;  %vm1451_vm9 = vcmask (!%p266_p9), 744448   ;;  %vm1615_vm10 = vcmask (!%p266_p9), 736256   ;;  %s4391_s19 = smov (!%p266_p9), 19   ;;  %vm1805_vm11 = vcmask (!%p266_p9), 867328  }
  0x13   : > { %1806 = vst.msk [vmem:[#allocation2 + $0x10] sm:$0xff] (!%p266_p9), %vm1805_vm11, %v4380_v0  ;;  %vm1822_vm12 = vcmask (!%p266_p9), 1047704   ;;  %vm1816_vm13 = vcmask (!%p266_p9), 154624   ;;  %vm1825_vm14 = vcmask (!%p266_p9), 711680   ;;  %vm1847_vm15 = vcmask (!%p266_p9), 64512  }
  0x15   : > { %s300_s17 = scalar_select %p299_p10, %s4460_s9, 1 }
  0x17   : > { %s4250_s18 = smul.u32 12, %s300_s17 }
  0x19   : > { %s303_s21 = scalar_lea.vmem %s5061_s0, %s4250_s18 }
  0x1a   : > { %v304_v1 = vld [vmem:[%s303_s21] sm:$0xff]  ;;  %v305_v3 = vld [vmem:[%s303_s21 + $0x8] sm:$0xf] }
  0x1b   : > { %312 = vrot.lane.b32.xlu1 %v304_v1, %s4382_s22  ;;  %v311_v2 = vcombine.high %v304_v1, %v304_v1 }
  0x1d   : > { %314 = vrot.lane.b32.xlu0 %v311_v2, %s4382_s22 }
  0x1f   : > { %627 = vrot.lane.b32.xlu1 %v311_v2, %s4383_s23 }
  0x21   : > { %316 = vrot.lane.b32.xlu0 %v305_v3, %s4382_s22 }
  0x23   : > { %625 = vrot.lane.b32.xlu1 %v304_v1, %s4383_s23 }
  0x25   : > { %629 = vrot.lane.b32.xlu0 %v305_v3, %s4383_s23 }
  0x27   : > { %793 = vrot.lane.b32.xlu1 %v305_v3, %s4384_s24 }
  0x29   : > { %791 = vrot.lane.b32.xlu0 %v311_v2, %s4384_s24 }
  0x2b   : > { %955 = vrot.lane.b32.xlu1 %v311_v2, %s4385_s25 }
  0x2d   : > { %789 = vrot.lane.b32.xlu0 %v304_v1, %s4384_s24 }
  0x2f   : > { %953 = vrot.lane.b32.xlu1 %v304_v1, %s4385_s25 }
  0x31   : > { %957 = vrot.lane.b32.xlu0 %v305_v3, %s4385_s25 }
  0x33   : > { %1121 = vrot.lane.b32.xlu1 %v305_v3, %s4386_s26 }
  0x35   : > { %1119 = vrot.lane.b32.xlu0 %v311_v2, %s4386_s26 }
  0x37   : > { %1283 = vrot.lane.b32.xlu1 %v311_v2, %s4387_s10 }
  0x39   : > { %1117 = vrot.lane.b32.xlu0 %v304_v1, %s4386_s26 }
  0x3b   : > { %1281 = vrot.lane.b32.xlu1 %v304_v1, %s4387_s10 }
  0x3d   : > { %1285 = vrot.lane.b32.xlu0 %v305_v3, %s4387_s10 }
  0x3f   : > { %1449 = vrot.lane.b32.xlu1 %v305_v3, %s4388_s12 }
  0x41   : > { %1447 = vrot.lane.b32.xlu0 %v311_v2, %s4388_s12 }
  0x43   : > { %1611 = vrot.lane.b32.xlu1 %v311_v2, %s4389_s13 }
  0x45   : > { %1445 = vrot.lane.b32.xlu0 %v304_v1, %s4388_s12 }
  0x47   : > { %1609 = vrot.lane.b32.xlu1 %v304_v1, %s4389_s13 }
  0x49   : > { %1613 = vrot.lane.b32.xlu0 %v305_v3, %s4389_s13 }
  0x4d   : > { %1774 = vperm.xlu0 %4303, %v1771_v4  }
  0x8d   : > { %v313_v6 = vpop.permute.xlu1 %312 }
  0x8f   : > { %v315_v7 = vpop.permute.xlu0 %314 }
  0x90   : > { %v319_v12 = vsel %vm318_vm2, %v313_v6, %v315_v7 }
  0x91   : > { %v628_v8 = vpop.permute.xlu1 %627 }
  0x93   : > { %v317_v9 = vpop.permute.xlu0 %316 }
  0x94   : > { %4005 = vmatpush3.msk.msra.mxu1 %vm325_vm1, %v317_v9  ;;  %v320_v10 = vsel %vm318_vm2, %v315_v7, %v317_v9 }
  0x95   : > { %3792 = vmatprep.subr.msk.mxu0 %vm325_vm1, %v320_v10  ;;  %v626_v13 = vpop.permute.xlu1 %625  ;;  %4007 = vmatmul.mubr.msk.f32.vlgmr.msra.gmra.mrb[0].mxu1 %vm321_vm3, %v3791_v11 }
  0x96   : > { %3793 = vmatpush1.msk.msra.mxu0 %vm325_vm1, %v319_v12  ;;  %4009 = vmatprep.subr.mxu1 %v4380_v0  ;;  %v632_v19 = vsel %vm631_vm4, %v626_v13, %v628_v8  ;;  %v1785_v12 = vlaneseq }
  0x97   : > { %3794 = vmatmul.mubr.msk.f32.vlgmr.msra.gmra.mrb[0].mxu0 %vm321_vm3, %v3791_v11  ;;  %3797 = vmatprep.subr.msk.mxu0 %vm325_vm1, %v311_v2  ;;  %v630_v14 = vpop.permute.xlu0 %629 }
  0x98   : > { %3798 = vmatpush1.msk.msra.mxu0 %vm325_vm1, %v304_v1  ;;  %v633_v15 = vsel %vm631_vm4, %v628_v8, %v630_v14  ;;  %546 = vmatprep.mubr.f32.mxu0 %v4380_v0 }
  0x99   : > { %4010 = vmatpush3.msk.msra.mxu1 %vm325_vm1, %v305_v3  ;;  %3803 = vmatprep.subr.msk.mxu0 %vm325_vm1, %v633_v15  ;;  %v794_v16 = vpop.permute.xlu1 %793 }
  0x9a   : > { %4011 = vmatprep.mubr.msk.f32.mxu1 %vm4381_vm0, %v4380_v0  ;;  %4014 = vmatprep.subr.mxu1 %v4380_v0 }
  0x9b   : > { %4012 = vmatmul.mubr.msk.f32.vlgmr.msra.gmra.mrb[2].mxu1 %vm321_vm3, %v306_v17  ;;  %v792_v18 = vpop.permute.xlu0 %791 }
  0x9c   : > { %4015 = vmatpush3.msk.msra.mxu1 %vm325_vm1, %v630_v14  ;;  %4016 = vmatprep.mubr.msk.f32.mxu1 %vm4381_vm0, %v4380_v0  ;;  %v797_v21 = vsel %vm795_vm5, %v792_v18, %v794_v16 }
  0x9d   : > { %4019 = vmatprep.subr.mxu1 %v4380_v0  ;;  %v956_v20 = vpop.permute.xlu1 %955 }
  0x9f   : > { %3799 = vmatmul.mubr.msk.f32.vlgmr.msra.gmra.mrb[0].mxu0 %vm321_vm3, %v306_v17  ;;  %v790_v23 = vpop.permute.xlu0 %789  ;;  %4017 = vmatmul.mubr.msk.f32.vlgmr.msra.gmra.mrb[4].mxu1 %vm321_vm3, %v3802_v22 }
  0xa0   : > { %3804 = vmatpush1.msk.msra.mxu0 %vm325_vm1, %v632_v19  ;;  %707 = vmatprep.mubr.f32.mxu0 %v4380_v0  ;;  %v796_v28 = vsel %vm795_vm5, %v790_v23, %v792_v18 }
  0xa1   : > { %3809 = vmatprep.subr.msk.mxu0 %vm325_vm1, %v797_v21  ;;  %4020 = vmatpush3.msk.msra.mxu1 %vm325_vm1, %v794_v16  ;;  %v954_v24 = vpop.permute.xlu1 %953  ;;  %v1786_v16 = vshrl.u32 %v1785_v12, 7 }
  0xa2   : > { %4021 = vmatprep.mubr.msk.f32.mxu1 %vm4381_vm0, %v4380_v0  ;;  %4024 = vmatprep.subr.mxu1 %v4380_v0  ;;  %v4602_v35 = vsel %vm959_vm6, %v954_v24, %v956_v20 }
  0xa3   : > { %v4569_v26 = vpop.permute.xlu0 %957  ;;  %4022 = vmatmul.mubr.msk.f32.vlgmr.msra.gmra.mrb[6].mxu1 %vm321_vm3, %v3808_v25  ;;  %v1795_v17 = vsub.s32 2, %v1786_v16 }
  0xa4   : > { %4025 = vmatpush3.msk.msra.mxu1 %vm325_vm1, %v4569_v26  ;;  %4026 = vmatprep.mubr.msk.f32.mxu1 %vm4381_vm0, %v4380_v0  ;;  %v4583_v30 = vsel %vm959_vm6, %v956_v20, %v4569_v26  ;;  %v1783_v20 = vld [vmem:[%s5067_s6] sm:$0x7] }
  0xa5   : > { %v1122_v29 = vpop.permute.xlu1 %1121  ;;  %4029 = vmatprep.subr.mxu1 %v4380_v0  ;;  %v1796_v24 = vrot.slane %v1783_v20, %v1795_v17 }
  0xa7   : > { %3805 = vmatmul.mubr.msk.f32.vlgmr.msra.gmra.mrb[0].mxu0 %vm321_vm3, %v3802_v22  ;;  %v1120_v31 = vpop.permute.xlu0 %1119  ;;  %4027 = vmatmul.mubr.msk.f32.vlgmr.msra.gmra.mrb[8].mxu1 %vm321_vm3, %v3814_v27 }
  0xa8   : > { %3810 = vmatpush1.msk.msra.mxu0 %vm325_vm1, %v796_v28  ;;  %871 = vmatprep.mubr.f32.mxu0 %v4380_v0  ;;  %v1125_v37 = vsel %vm1123_vm7, %v1120_v31, %v1122_v29  ;;  %v1787_v28 = vsub.s32 0, %v1786_v16 }
  0xa9   : > { %3815 = vmatprep.subr.msk.mxu0 %vm325_vm1, %v4583_v30  ;;  %v1284_v33 = vpop.permute.xlu1 %1283  ;;  %4030 = vmatpush3.msk.msra.mxu1 %vm325_vm1, %v1122_v29 }
  0xaa   : > { %4031 = vmatprep.mubr.msk.f32.mxu1 %vm4381_vm0, %v4380_v0  ;;  %4034 = vmatprep.subr.mxu1 %v4380_v0 }
  0xab   : > { %v1118_v34 = vpop.permute.xlu0 %1117  ;;  %4032 = vmatmul.mubr.msk.f32.vlgmr.msra.gmra.mrb[10].mxu1 %vm321_vm3, %v3820_v32 }
  0xac   : > { %4036 = vmatprep.mubr.msk.f32.mxu1 %vm4381_vm0, %v4380_v0  ;;  %v1124_v43 = vsel %vm1123_vm7, %v1118_v34, %v1120_v31  ;;  %v1791_v34 = vsub.s32 1, %v1786_v16  ;;  %v3861_v16 = vld [vmem:[%s5064_s3 + $0x30] sm:$0xff] }
  0xad   : > { %v1282_v36 = vpop.permute.xlu1 %1281 }
  0xae   : > { %v1288_v48 = vsel %vm1287_vm8, %v1282_v36, %v1284_v33 }
  0xaf   : > { %3811 = vmatmul.mubr.msk.f32.vlgmr.msra.gmra.mrb[0].mxu0 %vm321_vm3, %v3808_v25  ;;  %v1286_v38 = vpop.permute.xlu0 %1285 }
  0xb0   : > { %3816 = vmatpush1.msk.msra.mxu0 %vm325_vm1, %v4602_v35  ;;  %1035 = vmatprep.mubr.f32.mxu0 %v4380_v0  ;;  %v1289_v44 = vsel %vm1287_vm8, %v1284_v33, %v1286_v38 }
  0xb1   : > { %3821 = vmatprep.subr.msk.mxu0 %vm325_vm1, %v1125_v37  ;;  %4035 = vmatpush3.msk.msra.mxu1 %vm325_vm1, %v1286_v38  ;;  %v1450_v40 = vpop.permute.xlu1 %1449 }
  0xb2   : > { %4037 = vmatmul.mubr.msk.f32.vlgmr.msra.gmra.mrb[12].mxu1 %vm321_vm3, %v3826_v39  ;;  %4039 = vmatprep.subr.mxu1 %v4380_v0 }
  0xb3   : > { %v1448_v41 = vpop.permute.xlu0 %1447  ;;  %4040 = vmatpush3.msk.msra.mxu1 %vm325_vm1, %v1450_v40  ;;  %4041 = vmatprep.mubr.msk.f32.mxu1 %vm4381_vm0, %v4380_v0 }
  0xb4   : > { %4044 = vmatprep.subr.mxu1 %v4380_v0  ;;  %v1453_v49 = vsel %vm1451_vm9, %v1448_v41, %v1450_v40  ;;  %v1792_v40 = vrot.slane %v1783_v20, %v1791_v34 }
  0xb5   : > { %v1612_v50 = vpop.permute.xlu1 %1611 }
  0xb6   : > { %4042 = vmatmul.mubr.msk.f32.vlgmr.msra.gmra.mrb[14].mxu1 %vm321_vm3, %v3832_v42 }
  0xb7   : > { %3817 = vmatmul.mubr.msk.f32.vlgmr.msra.gmra.mrb[0].mxu0 %vm321_vm3, %v3814_v27  ;;  %v1446_v45 = vpop.permute.xlu0 %1445  ;;  %4046 = vmatprep.mubr.msk.f32.mxu1 %vm4381_vm0, %v4380_v0 }
  0xb8   : > { %3822 = vmatpush1.msk.msra.mxu0 %vm325_vm1, %v1124_v43  ;;  %1199 = vmatprep.mubr.f32.mxu0 %v4380_v0  ;;  %v1452_v51 = vsel %vm1451_vm9, %v1446_v45, %v1448_v41 }
  0xb9   : > { %3827 = vmatprep.subr.msk.mxu0 %vm325_vm1, %v1289_v44  ;;  %v1610_v53 = vpop.permute.xlu1 %1609 }
  0xba   : > { %v1616_v54 = vsel %vm1615_vm10, %v1610_v53, %v1612_v50  ;;  %v3844_v53 = vld [vmem:[%s5064_s3 + $0x8] sm:$0xff] }
  0xbb   : > { %v1614_v47 = vpop.permute.xlu0 %1613 }
  0xbc   : > { %4045 = vmatpush3.msk.msra.mxu1 %vm325_vm1, %v1614_v47  ;;  %v1617_v52 = vsel %vm1615_vm10, %v1612_v50, %v1614_v47 }
  0xbd   : > { %4047 = vmatmul.mubr.msk.f32.vlgmr.msra.gmra.mrb[16].mxu1 %vm321_vm3, %v3838_v46  ;;  %4049 = vmatprep.subr.mxu1 %v4380_v0 }
  0xbe   : > { %4051 = vmatprep.mubr.msk.f32.mxu1 %vm4381_vm0, %v4380_v0 }
  0xbf   : > { %3823 = vmatmul.mubr.msk.f32.vlgmr.msra.gmra.mrb[0].mxu0 %vm321_vm3, %v3820_v32  ;;  %v1788_v32 = vrot.slane %v1783_v20, %v1787_v28 }
  0xc0   : > { %3828 = vmatpush1.msk.msra.mxu0 %vm325_vm1, %v1288_v48  ;;  %1363 = vmatprep.mubr.f32.mxu0 %v4380_v0 }
  0xc1   : > { %3833 = vmatprep.subr.msk.mxu0 %vm325_vm1, %v1453_v49  ;;  %v3256_v49 = vld [vmem:[%s5065_s4] sm:$0xff] }
  0xc7   : > { %3829 = vmatmul.mubr.msk.f32.vlgmr.msra.gmra.mrb[0].mxu0 %vm321_vm3, %v3826_v39 }
  0xc8   : > { %3834 = vmatpush1.msk.msra.mxu0 %vm325_vm1, %v1452_v51  ;;  %1527 = vmatprep.mubr.f32.mxu0 %v4380_v0 }
  0xc9   : > { %3839 = vmatprep.subr.msk.mxu0 %vm325_vm1, %v1617_v52 }
  0xcc   : > { %v1775_v19 = vpop.permute.xlu0 %1774 }
  0xcf   : > { %3835 = vmatmul.mubr.msk.f32.vlgmr.msra.gmra.mrb[0].mxu0 %vm321_vm3, %v3832_v42 }
  0xd0   : > { %3840 = vmatpush1.msk.msra.mxu0 %vm325_vm1, %v1616_v54  ;;  %1691 = vmatprep.mubr.f32.mxu0 %v4380_v0 }
  0xd7   : > { %3841 = vmatmul.mubr.msk.f32.vlgmr.msra.gmra.mrb[0].mxu0 %vm321_vm3, %v3838_v46 }
  0xd8   : > { %1915 = vmatprep.mubr.f32.mxu0 %v4380_v0 }
 0x168   : > { %v469_v55 = vpop.f32.mrb[0].mxu1 }
 0x169   : > { %v4008_v56 = vpop.f32.mrb[1].mxu1 }
 0x16e   : > { %v619_v57 = vpop.f32.mrb[2].mxu1 }
 0x16f   : > { %v620_v58 = vadd.f32 %v619_v57, %v469_v55  ;;  %v4013_v59 = vpop.f32.mrb[3].mxu1 }
 0x172   : > { %v780_v60 = vpop.f32.mrb[4].mxu1 }
 0x173   : > { %v786_v61 = vadd.f32 %v780_v60, %v620_v58  ;;  %v4018_v62 = vpop.f32.mrb[5].mxu1  ;;  %v1830_v58 = vld [vmem:[%s5064_s3] sm:$0xff] }
 0x174   : > { %v3849_v62 = vld [vmem:[%s5064_s3 + $0x10] sm:$0xff] }
 0x176   : > { %v944_v63 = vpop.f32.mrb[6].mxu1 }
 0x177   : > { %v950_v1 = vadd.f32 %v944_v63, %v786_v61  ;;  %v4023_v2 = vpop.f32.mrb[7].mxu1 }
 0x17a   : > { %v1108_v3 = vpop.f32.mrb[8].mxu1 }
 0x17b   : > { %v1114_v4 = vadd.f32 %v1108_v3, %v950_v1  ;;  %v4028_v5 = vpop.f32.mrb[9].mxu1 }
 0x17e   : > { %v1272_v6 = vpop.f32.mrb[10].mxu1 }
 0x17f   : > { %v1278_v7 = vadd.f32 %v1272_v6, %v1114_v4  ;;  %v4033_v8 = vpop.f32.mrb[11].mxu1  ;;  %v3852_v4 = vld [vmem:[%s5064_s3 + $0x18] sm:$0xff] }
 0x180   : > { %v3855_v8 = vld [vmem:[%s5064_s3 + $0x20] sm:$0xff] }
 0x185   : > { %v1436_v9 = vpop.f32.mrb[12].mxu1 }
 0x186   : > { %v1442_v10 = vadd.f32 %v1436_v9, %v1278_v7  ;;  %v4038_v11 = vpop.f32.mrb[13].mxu1 }
 0x189   : > { %v1600_v13 = vpop.f32.mrb[14].mxu1 }
 0x18a   : > { %v1606_v14 = vadd.f32 %v1600_v13, %v1442_v10  ;;  %v4043_v15 = vpop.f32.mrb[15].mxu1  ;;  %v3858_v13 = vld [vmem:[%s5064_s3 + $0x28] sm:$0xff] }
 0x190   : > { %v1764_v18 = vpop.f32.mrb[16].mxu1 }
 0x191   : > { %v1770_v21 = vadd.f32 %v1764_v18, %v1606_v14  ;;  %v4048_v22 = vpop.f32.mrb[17].mxu1 }
 0x193   : > { %v1779_v23 = vadd.f32 %v1775_v19, %v1770_v21 }
 0x195   : > { %v1782_v25 = vmax.f32 %v1779_v23, 0.0  ;;  %v3864_v23 = vld [vmem:[%s5064_s3 + $0x38] sm:$0xff] }
 0x197   : > { %v1802_v27 = vmul.f32 %v1796_v24, %v1782_v25 }
 0x199   : > { %1814 = vrot.lane.b32.xlu0 %v1802_v27, %s4391_s19 }
 0x1aa   : > { %v1693_v29 = vpop.f32.mrb[0].mxu0 }
 0x1ab   : > { %v1777_v31 = vadd.f32 %v1775_v19, %v1693_v29  ;;  %v1695_v33 = vpop.f32.mrb[1].mxu0  ;;  %v3867_v29 = vld [vmem:[%s5064_s3 + $0x40] sm:$0xff] }
 0x1ac   : > { %v1778_v36 = vadd.f32 %v1775_v19, %v1695_v33 }
 0x1ad   : > { %v1780_v37 = vmax.f32 %v1777_v31, 0.0 }
 0x1ae   : > { %v1781_v39 = vmax.f32 %v1778_v36, 0.0 }
 0x1af   : > { %v1800_v38 = vmul.f32 %v1788_v32, %v1780_v37  ;;  %v3318_v37 = vld [vmem:[%s5068_s7 + $0x80] sm:$0xff] }
 0x1b0   : > { %v1801_v41 = vmul.f32 %v1792_v40, %v1781_v39 }
 0x1b1   : > { %1810 = vrot.lane.b32.xlu1 %v1800_v38, %s4391_s19  ;;  %v3319_v38 = vld [vmem:[%s5068_s7 + $0x88] sm:$0xff] }
 0x1b2   : > { %v4787_v40 = vpack.c.bf16 %v3319_v38, %v3318_v37 }
 0x1b5   : > { %1812 = vrot.lane.b32.xlu1 %v1801_v41, %s4391_s19 }
 0x20b   : > { %v1815_v43 = vpop.permute.xlu0 %1814 }
 0x223   : > { %v1811_v42 = vpop.permute.xlu1 %1810 }
 0x224   : > { %1823 = vst.msk [vmem:[#allocation2] sm:$0xff] %vm1822_vm12, %v1811_v42 }
 0x227   : > { %v1813_v44 = vpop.permute.xlu1 %1812 }
 0x228   : > { %v1817_v45 = vsel %vm1816_vm13, %v1811_v42, %v1813_v44  ;;  %v1818_v46 = vsel %vm1816_vm13, %v1813_v44, %v1815_v43  ;;  %v3302_v42 = vld [vmem:[%s5068_s7] sm:$0xff]  ;;  %v3303_v43 = vld [vmem:[%s5068_s7 + $0x8] sm:$0xff]  ;;  %v3320_v44 = vld [vmem:[%s5068_s7 + $0x90] sm:$0xff] }
 0x229   : > { %1826 = vst.msk [vmem:[#allocation2 + $0x10] sm:$0xff] %vm1825_vm14, %v1818_v46  ;;  %1838 = vrot.lane.b32.xlu1 %v1817_v45, %s4382_s22  ;;  %v4805_v46 = vpack.c.bf16 %v3303_v43, %v3302_v42 }
 0x22b   : > { %v1827_v47 = vld [vmem:[#allocation2] sm:$0xff] }
 0x22d   : > { %1836 = vrot.lane.b32.xlu1 %v1827_v47, %s4382_s22 }
 0x230   : > { %v1829_v48 = vld [vmem:[#allocation2 + $0x10] sm:$0xff] }
 0x231   : > { %1840 = vrot.lane.b32.xlu0 %v1829_v48, %s4382_s22  ;;  %2142 = vrot.lane.b32.xlu1 %v1829_v48, %s4383_s23 }
 0x235   : > { %2140 = vrot.lane.b32.xlu0 %v1817_v45, %s4383_s23  ;;  %2300 = vrot.lane.b32.xlu1 %v1817_v45, %s4384_s24 }
 0x239   : > { %2138 = vrot.lane.b32.xlu0 %v1827_v47, %s4383_s23  ;;  %2298 = vrot.lane.b32.xlu1 %v1827_v47, %s4384_s24 }
 0x23d   : > { %2302 = vrot.lane.b32.xlu0 %v1829_v48, %s4384_s24  ;;  %2462 = vrot.lane.b32.xlu1 %v1829_v48, %s4385_s25 }
 0x241   : > { %2460 = vrot.lane.b32.xlu0 %v1817_v45, %s4385_s25  ;;  %2620 = vrot.lane.b32.xlu1 %v1817_v45, %s4386_s26 }
 0x245   : > { %2458 = vrot.lane.b32.xlu0 %v1827_v47, %s4385_s25  ;;  %2618 = vrot.lane.b32.xlu1 %v1827_v47, %s4386_s26  ;;  %s3877_s25 = sshll.u32 %s4460_s9, 7  ;;  %s4393_s9 = smov [#allocation3]  }
 0x246   : > { %s5019_s20 = scalar_lea.hbm %s5069_s8, %s3877_s25  ;;  %s4320_s18 = sshll.u32 %s4393_s9, 4  ;;  %s4321_s18 = int_to_ptr.vmem [resolvable:$false] %s4320_s18 }
 0x247   : > { %s4322_s19 = scalar_lea.vmem %s4321_s18, 256 }
 0x249   : > { %2622 = vrot.lane.b32.xlu0 %v1829_v48, %s4386_s26  ;;  %2782 = vrot.lane.b32.xlu1 %v1829_v48, %s4387_s10 }
 0x24d   : > { %2780 = vrot.lane.b32.xlu0 %v1817_v45, %s4387_s10  ;;  %2940 = vrot.lane.b32.xlu1 %v1817_v45, %s4388_s12 }
 0x251   : > { %2778 = vrot.lane.b32.xlu0 %v1827_v47, %s4387_s10  ;;  %2938 = vrot.lane.b32.xlu1 %v1827_v47, %s4388_s12 }
 0x255   : > { %2942 = vrot.lane.b32.xlu0 %v1829_v48, %s4388_s12  ;;  %3102 = vrot.lane.b32.xlu1 %v1829_v48, %s4389_s13 }
 0x259   : > { %3100 = vrot.lane.b32.xlu0 %v1817_v45, %s4389_s13  ;;  %3259 = vperm.xlu1 %4304, %v3256_v49   ;;  %v3305_v49 = vld [vmem:[%s5068_s7 + $0x18] sm:$0xff] }
 0x25d   : > { %3098 = vrot.lane.b32.xlu0 %v1827_v47, %s4389_s13 }
 0x29b   : > { %v1839_v50 = vpop.permute.xlu1 %1838 }
 0x29f   : > { %v1837_v51 = vpop.permute.xlu1 %1836 }
 0x2a0   : > { %v1842_v56 = vsel %vm318_vm2, %v1837_v51, %v1839_v50  ;;  %v3323_v51 = vld [vmem:[%s5068_s7 + $0xa8] sm:$0xff] }
 0x2a3   : > { %v1841_v52 = vpop.permute.xlu0 %1840  ;;  %v2143_v54 = vpop.permute.xlu1 %2142 }
 0x2a4   : > { %4050 = vmatpush3.msra.mxu1 %v1841_v52  ;;  %v1843_v55 = vsel %vm318_vm2, %v1839_v50, %v1841_v52  ;;  %v3322_v50 = vld [vmem:[%s5068_s7 + $0xa0] sm:$0xff] }
 0x2a5   : > { %1851 = vmatprep.subr.mxu0 %v1843_v55  ;;  %4054 = vmatprep.subr.mxu1 %v4380_v0  ;;  %v3307_v55 = vld [vmem:[%s5068_s7 + $0x28] sm:$0xff] }
 0x2a6   : > { %4052 = vmatmul.mubr.msk.f32.vlgmr.msra.gmra.mrb[18].mxu1 %vm1847_vm15, %v3844_v53  ;;  %1852 = vmatpush1.msra.mxu0 %v1842_v56  ;;  %v3324_v56 = vld [vmem:[%s5068_s7 + $0xb0] sm:$0xff] }
 0x2a7   : > { %4055 = vmatpush3.msra.mxu1 %v1829_v48  ;;  %v2141_v57 = vpop.permute.xlu0 %2140  ;;  %3845 = vmatmul.mubr.msk.f32.vlgmr.msra.gmra.mrb[2].mxu0 %vm1847_vm15, %v3844_v53  ;;  %v2301_v59 = vpop.permute.xlu1 %2300  ;;  %v3304_v48 = vld [vmem:[%s5068_s7 + $0x10] sm:$0xff]  ;;  %v4827_v53 = vpack.c.bf16 %v3323_v51, %v3322_v50 }
 0x2a8   : > { %1995 = vmatprep.subr.mxu0 %v1817_v45  ;;  %4056 = vmatprep.mubr.msk.f32.mxu1 %vm4381_vm0, %v4380_v0  ;;  %v2145_v60 = vsel %vm631_vm4, %v2141_v57, %v2143_v54  ;;  %v3321_v45 = vld [vmem:[%s5068_s7 + $0x98] sm:$0xff]  ;;  %v4824_v52 = vpack.c.bf16 %v3305_v49, %v3304_v48 }
 0x2a9   : > { %4059 = vmatprep.subr.mxu1 %v4380_v0  ;;  %1996 = vmatpush1.msra.mxu0 %v1827_v47  ;;  %v4807_v47 = vpack.c.bf16 %v3321_v45, %v3320_v44 }
 0x2aa   : > { %4057 = vmatmul.mubr.msk.f32.vlgmr.msra.gmra.mrb[20].mxu1 %vm1847_vm15, %v1830_v58  ;;  %2152 = vmatprep.subr.mxu0 %v2145_v60  ;;  %v3309_v60 = vld [vmem:[%s5068_s7 + $0x38] sm:$0xff] }
 0x2ab   : > { %v2139_v61 = vpop.permute.xlu0 %2138  ;;  %4060 = vmatpush3.msra.mxu1 %v2143_v54  ;;  %4061 = vmatprep.mubr.msk.f32.mxu1 %vm4381_vm0, %v4380_v0  ;;  %v2299_v63 = vpop.permute.xlu1 %2298  ;;  %v3306_v54 = vld [vmem:[%s5068_s7 + $0x20] sm:$0xff] }
 0x2ac   : > { %4064 = vmatprep.subr.mxu1 %v4380_v0  ;;  %2059 = vmatprep.mubr.f32.mxu0 %v4380_v0  ;;  %v2144_v1 = vsel %vm631_vm4, %v2139_v61, %v2141_v57  ;;  %v2304_v9 = vsel %vm795_vm5, %v2299_v63, %v2301_v59  ;;  %v4842_v57 = vpack.c.bf16 %v3307_v55, %v3306_v54  ;;  %v3326_v61 = vld [vmem:[%s5068_s7 + $0xc0] sm:$0xff]  ;;  %vm3346_vm4 = vcmask 1040384  }
 0x2ae   : > { %4062 = vmatmul.mubr.msk.f32.vlgmr.msra.gmra.mrb[22].mxu1 %vm1847_vm15, %v3849_v62 }
 0x2af   : > { %v2303_v2 = vpop.permute.xlu0 %2302  ;;  %3847 = vmatmul.mubr.msk.f32.vlgmr.msra.gmra.mrb[2].mxu0 %vm1847_vm15, %v1830_v58  ;;  %4066 = vmatprep.mubr.msk.f32.mxu1 %vm4381_vm0, %v4380_v0  ;;  %v2463_v3 = vpop.permute.xlu1 %2462 }
 0x2b0   : > { %4065 = vmatpush3.msra.mxu1 %v2303_v2  ;;  %2153 = vmatpush1.msra.mxu0 %v2144_v1  ;;  %v2305_v5 = vsel %vm795_vm5, %v2301_v59, %v2303_v2  ;;  %v3308_v59 = vld [vmem:[%s5068_s7 + $0x30] sm:$0xff]  ;;  %v3310_v2 = vld [vmem:[%s5068_s7 + $0x40] sm:$0xff] }
 0x2b1   : > { %2312 = vmatprep.subr.mxu0 %v2305_v5  ;;  %4069 = vmatprep.subr.mxu1 %v4380_v0  ;;  %v4860_v63 = vpack.c.bf16 %v3309_v60, %v3308_v59  ;;  %v3329_v5 = vld [vmem:[%s5068_s7 + $0xd8] sm:$0xff] }
 0x2b2   : > { %4067 = vmatmul.mubr.msk.f32.vlgmr.msra.gmra.mrb[24].mxu1 %vm1847_vm15, %v3852_v4  ;;  %2216 = vmatprep.mubr.f32.mxu0 %v4380_v0 }
 0x2b3   : > { %v2461_v6 = vpop.permute.xlu0 %2460  ;;  %4070 = vmatpush3.msra.mxu1 %v2463_v3  ;;  %4071 = vmatprep.mubr.msk.f32.mxu1 %vm4381_vm0, %v4380_v0  ;;  %v2621_v7 = vpop.permute.xlu1 %2620 }
 0x2b4   : > { %4074 = vmatprep.subr.mxu1 %v4380_v0  ;;  %v2465_v12 = vsel %vm959_vm6, %v2461_v6, %v2463_v3  ;;  %v3311_v3 = vld [vmem:[%s5068_s7 + $0x48] sm:$0xff] }
 0x2b6   : > { %4072 = vmatmul.mubr.msk.f32.vlgmr.msra.gmra.mrb[26].mxu1 %vm1847_vm15, %v3855_v8 }
 0x2b7   : > { %v2459_v10 = vpop.permute.xlu0 %2458  ;;  %3850 = vmatmul.mubr.msk.f32.vlgmr.msra.gmra.mrb[2].mxu0 %vm1847_vm15, %v3849_v62  ;;  %v2619_v11 = vpop.permute.xlu1 %2618  ;;  %4076 = vmatprep.mubr.msk.f32.mxu1 %vm4381_vm0, %v4380_v0  ;;  %v3327_v62 = vld [vmem:[%s5068_s7 + $0xc8] sm:$0xff] }
 0x2b8   : > { %2313 = vmatpush1.msra.mxu0 %v2304_v9  ;;  %2376 = vmatprep.mubr.f32.mxu0 %v4380_v0  ;;  %v2464_v17 = vsel %vm959_vm6, %v2459_v10, %v2461_v6  ;;  %v2624_v24 = vsel %vm1123_vm7, %v2619_v11, %v2621_v7  ;;  %v4863_v1 = vpack.c.bf16 %v3327_v62, %v3326_v61  ;;  %v3313_v9 = vld [vmem:[%s5068_s7 + $0x58] sm:$0xff]  ;;  %v3330_v10 = vld [vmem:[%s5068_s7 + $0xe0] sm:$0xff]  ;;  %v3331_v11 = vld [vmem:[%s5068_s7 + $0xe8] sm:$0xff]  ;;  %vm3343_vm6 = vcmask 400384  }
 0x2b9   : > { %2472 = vmatprep.subr.mxu0 %v2465_v12  ;;  %v4878_v6 = vpack.c.bf16 %v3311_v3, %v3310_v2 }
 0x2bb   : > { %v2623_v14 = vpop.permute.xlu0 %2622  ;;  %v2783_v15 = vpop.permute.xlu1 %2782 }
 0x2bc   : > { %4075 = vmatpush3.msra.mxu1 %v2623_v14  ;;  %v2625_v20 = vsel %vm1123_vm7, %v2621_v7, %v2623_v14  ;;  %v3314_v14 = vld [vmem:[%s5068_s7 + $0x60] sm:$0xff] }
 0x2bd   : > { %4079 = vmatprep.subr.mxu1 %v4380_v0  ;;  %4077 = vmatmul.mubr.msk.f32.vlgmr.msra.gmra.mrb[28].mxu1 %vm1847_vm15, %v3858_v13 }
 0x2be   : > { %4080 = vmatpush3.msra.mxu1 %v2783_v15  ;;  %4081 = vmatprep.mubr.msk.f32.mxu1 %vm4381_vm0, %v4380_v0 }
 0x2bf   : > { %v2781_v18 = vpop.permute.xlu0 %2780  ;;  %3853 = vmatmul.mubr.msk.f32.vlgmr.msra.gmra.mrb[2].mxu0 %vm1847_vm15, %v3852_v4  ;;  %4084 = vmatprep.subr.mxu1 %v4380_v0  ;;  %v2941_v19 = vpop.permute.xlu1 %2940  ;;  %v3328_v4 = vld [vmem:[%s5068_s7 + $0xd0] sm:$0xff] }
 0x2c0   : > { %2473 = vmatpush1.msra.mxu0 %v2464_v17  ;;  %2536 = vmatprep.mubr.f32.mxu0 %v4380_v0  ;;  %v2785_v27 = vsel %vm1287_vm8, %v2781_v18, %v2783_v15  ;;  %v4881_v7 = vpack.c.bf16 %v3329_v5, %v3328_v4  ;;  %v3315_v15 = vld [vmem:[%s5068_s7 + $0x68] sm:$0xff]  ;;  %v3333_v17 = vld [vmem:[%s5068_s7 + $0xf8] sm:$0xff] }
 0x2c1   : > { %2632 = vmatprep.subr.mxu0 %v2625_v20  ;;  %4082 = vmatmul.mubr.msk.f32.vlgmr.msra.gmra.mrb[30].mxu1 %vm1847_vm15, %v3861_v16  ;;  %v3316_v20 = vld [vmem:[%s5068_s7 + $0x70] sm:$0xff] }
 0x2c2   : > { %4086 = vmatprep.mubr.msk.f32.mxu1 %vm4381_vm0, %v4380_v0 }
 0x2c3   : > { %v2779_v21 = vpop.permute.xlu0 %2778  ;;  %v2939_v22 = vpop.permute.xlu1 %2938 }
 0x2c4   : > { %v2784_v31 = vsel %vm1287_vm8, %v2779_v21, %v2781_v18  ;;  %v2944_v34 = vsel %vm1451_vm9, %v2939_v22, %v2941_v19  ;;  %v4914_v18 = vpack.c.bf16 %v3315_v15, %v3314_v14  ;;  %v3317_v21 = vld [vmem:[%s5068_s7 + $0x78] sm:$0xff] }
 0x2c5   : > { %v4926_v22 = vpack.c.bf16 %v3317_v21, %v3316_v20 }
 0x2c7   : > { %v2943_v25 = vpop.permute.xlu0 %2942  ;;  %3856 = vmatmul.mubr.msk.f32.vlgmr.msra.gmra.mrb[2].mxu0 %vm1847_vm15, %v3855_v8  ;;  %v3103_v28 = vpop.permute.xlu1 %3102  ;;  %v3312_v8 = vld [vmem:[%s5068_s7 + $0x50] sm:$0xff] }
 0x2c8   : > { %4085 = vmatpush3.msra.mxu1 %v2943_v25  ;;  %2633 = vmatpush1.msra.mxu0 %v2624_v24  ;;  %v2945_v32 = vsel %vm1451_vm9, %v2941_v19, %v2943_v25  ;;  %v4896_v12 = vpack.c.bf16 %v3313_v9, %v3312_v8  ;;  %v3335_v24 = vld [vmem:[%s5068_s7 + $0x108] sm:$0xff] }
 0x2c9   : > { %2792 = vmatprep.subr.mxu0 %v2785_v27  ;;  %4087 = vmatmul.mubr.msk.f32.vlgmr.msra.gmra.mrb[32].mxu1 %vm1847_vm15, %v3864_v23  ;;  %v4392_v27 = vmov 0.0|0.0  }
 0x2ca   : > { %4089 = vmatprep.subr.mxu1 %v4380_v0  ;;  %4091 = vmatprep.mubr.msk.f32.mxu1 %vm4381_vm0, %v4380_v0 }
 0x2cb   : > { %4090 = vmatpush3.msra.mxu1 %v3103_v28  ;;  %2696 = vmatprep.mubr.f32.mxu0 %v4380_v0  ;;  %v3101_v33 = vpop.permute.xlu0 %3100 }
 0x2cc   : > { %4111 = vmatprep.subr.mxu1 %v4380_v0  ;;  %v3105_v36 = vsel %vm1615_vm10, %v3101_v33, %v3103_v28  ;;  %v3336_v28 = vld [vmem:[%s5068_s7 + $0x110] sm:$0xff] }
 0x2cd   : > { %4092 = vmatmul.mubr.msk.f32.vlgmr.msra.gmra.mrb[34].mxu1 %vm1847_vm15, %v3867_v29 }
 0x2ce   : > { %4113 = vmatprep.mubr.msk.f32.mxu1 %vm4381_vm0, %v4380_v0 }
 0x2cf   : > { %3859 = vmatmul.mubr.msk.f32.vlgmr.msra.gmra.mrb[2].mxu0 %vm1847_vm15, %v3858_v13  ;;  %v3099_v39 = vpop.permute.xlu0 %3098  ;;  %v4899_v13 = vpack.c.bf16 %v3331_v11, %v3330_v10 }
 0x2d0   : > { %2793 = vmatpush1.msra.mxu0 %v2784_v31  ;;  %2856 = vmatprep.mubr.f32.mxu0 %v4380_v0  ;;  %v3104_v41 = vsel %vm1615_vm10, %v3099_v39, %v3101_v33  ;;  %v3339_v33 = vld [vmem:[%s5068_s7 + $0x128] sm:$0xff] }
 0x2d1   : > { %2952 = vmatprep.subr.mxu0 %v2945_v32  ;;  %v3338_v32 = vld [vmem:[%s5068_s7 + $0x120] sm:$0xff] }
 0x2d7   : > { %3862 = vmatmul.mubr.msk.f32.vlgmr.msra.gmra.mrb[2].mxu0 %vm1847_vm15, %v3861_v16  ;;  %v3332_v16 = vld [vmem:[%s5068_s7 + $0xf0] sm:$0xff] }
 0x2d8   : > { %2953 = vmatpush1.msra.mxu0 %v2944_v34  ;;  %3016 = vmatprep.mubr.f32.mxu0 %v4380_v0  ;;  %v4917_v19 = vpack.c.bf16 %v3333_v17, %v3332_v16  ;;  %v4967_v34 = vld [vmem:[%s5068_s7 + $0x130] sm:$0x1]  ;;  %v3260_v4 = vpop.permute.xlu1 %3259 }
 0x2d9   : > { %3112 = vmatprep.subr.mxu0 %v3105_v36 }
 0x2df   : > { %3865 = vmatmul.mubr.msk.f32.vlgmr.msra.gmra.mrb[2].mxu0 %vm1847_vm15, %v3864_v23  ;;  %v3334_v23 = vld [vmem:[%s5068_s7 + $0x100] sm:$0xff] }
 0x2e0   : > { %3113 = vmatpush1.msra.mxu0 %v3104_v41  ;;  %3176 = vmatprep.mubr.f32.mxu0 %v4380_v0  ;;  %v4936_v25 = vpack.c.bf16 %v3335_v24, %v3334_v23 }
 0x2e1   : > { %4134 = vmatprep.subr.bf16.mxu0 %v4787_v40 }
 0x2e7   : > { %3868 = vmatmul.mubr.msk.f32.vlgmr.msra.gmra.mrb[2].mxu0 %vm1847_vm15, %v3867_v29  ;;  %v3337_v29 = vld [vmem:[%s5068_s7 + $0x118] sm:$0xff] }
 0x2e8   : > { %4136 = vmatpush3.bf16.msra.mxu0 %v4805_v46  ;;  %3414 = vmatprep.mubr.f32.mxu0 %v4583_v30  ;;  %v3325_v30 = vld [vmem:[%s5068_s7 + $0xb8] sm:$0xff]  ;;  %v4947_v31 = vpack.c.bf16 %v3337_v29, %v3336_v28 }
 0x2e9   : > { %4138 = vmatprep.subr.bf16.mxu0 %v4807_v47  ;;  %v4845_v58 = vpack.c.bf16 %v3325_v30, %v3324_v56 }
 0x2ec   : > { %4140 = vmatpush3.bf16.msra.mxu0 %v4824_v52 }
 0x2ed   : > { %4142 = vmatprep.subr.bf16.mxu0 %v4827_v53 }
 0x2f0   : > { %4144 = vmatpush3.bf16.msra.mxu0 %v4842_v57 }
 0x2f1   : > { %4146 = vmatprep.subr.bf16.mxu0 %v4845_v58 }
 0x2f4   : > { %4148 = vmatpush3.bf16.msra.mxu0 %v4860_v63 }
 0x2f5   : > { %4150 = vmatprep.subr.bf16.mxu0 %v4863_v1 }
 0x2f8   : > { %4152 = vmatpush3.bf16.msra.mxu0 %v4878_v6 }
 0x2f9   : > { %4154 = vmatprep.subr.bf16.mxu0 %v4881_v7 }
 0x2fc   : > { %4156 = vmatpush3.bf16.msra.mxu0 %v4896_v12 }
 0x2fd   : > { %4158 = vmatprep.subr.bf16.mxu0 %v4899_v13 }
 0x300   : > { %4160 = vmatpush3.bf16.msra.mxu0 %v4914_v18 }
 0x301   : > { %4162 = vmatprep.subr.bf16.mxu0 %v4917_v19 }
 0x304   : > { %4164 = vmatpush3.bf16.msra.mxu0 %v4926_v22 }
 0x305   : > { %4165 = vmatprep.subr.bf16.mxu0 %v4392_v27 }
 0x307   : > { %3415 = vmatmul.mubr.f32.vlgmr.msra.gmra.mrb[4].mxu0 %v4602_v35  ;;  %v4959_v35 = vpack.c.bf16 %v3339_v33, %v3338_v32 }
 0x308   : > { %4167 = vmatpush3.bf16.msra.mxu0 %v4936_v25  ;;  %4108 = vmatprep.mubr.msk.f32.mxu0 %vm4381_vm0, %v4380_v0 }
 0x309   : > { %4168 = vmatprep.subr.bf16.mxu0 %v4392_v27 }
 0x30c   : > { %4170 = vmatpush3.bf16.msra.mxu0 %v4947_v31 }
 0x30d   : > { %4171 = vmatprep.subr.bf16.mxu0 %v4392_v27 }
 0x310   : > { %4173 = vmatpush3.bf16.msra.mxu0 %v4959_v35 }
 0x311   : > { %4106 = vmatprep.subr.mxu0 %v4380_v0 }
 0x314   : > { %4107 = vmatpush3.msk.msra.mxu0 %vm3346_vm4, %v4967_v34 }
 0x315   : > { %4109 = vmatmul.mubr.msk.f32.vlgmr.msra.gmra.mrb[6].mxu0 %vm3343_vm6, %v4569_v26 }
 0x379   : > { %v1988_v36 = vpop.f32.mrb[18].mxu1 }
 0x37a   : > { %v4053_v37 = vpop.f32.mrb[19].mxu1 }
 0x37d   : > { %v2132_v38 = vpop.f32.mrb[20].mxu1 }
 0x37e   : > { %v2133_v39 = vadd.f32 %v2132_v38, %v1988_v36  ;;  %v4058_v41 = vpop.f32.mrb[21].mxu1  ;;  %v3490_v36 = vld [vmem:[%s5066_s5] sm:$0xff] }
 0x381   : > { %v2289_v42 = vpop.f32.mrb[22].mxu1 }
 0x382   : > { %v2295_v43 = vadd.f32 %v2289_v42, %v2133_v39  ;;  %v4063_v44 = vpop.f32.mrb[23].mxu1 }
 0x385   : > { %v2449_v45 = vpop.f32.mrb[24].mxu1 }
 0x386   : > { %v2455_v48 = vadd.f32 %v2449_v45, %v2295_v43  ;;  %v4068_v49 = vpop.f32.mrb[25].mxu1 }
 0x389   : > { %v2609_v50 = vpop.f32.mrb[26].mxu1 }
 0x38a   : > { %v2615_v51 = vadd.f32 %v2609_v50, %v2455_v48  ;;  %v4073_v54 = vpop.f32.mrb[27].mxu1 }
 0x390   : > { %v2769_v55 = vpop.f32.mrb[28].mxu1 }
 0x391   : > { %v2775_v56 = vadd.f32 %v2769_v55, %v2615_v51  ;;  %v4078_v30 = vpop.f32.mrb[29].mxu1 }
 0x394   : > { %v2929_v59 = vpop.f32.mrb[30].mxu1 }
 0x395   : > { %v2935_v60 = vadd.f32 %v2929_v59, %v2775_v56  ;;  %v4083_v26 = vpop.f32.mrb[31].mxu1 }
 0x39c   : > { %v3089_v61 = vpop.f32.mrb[32].mxu1 }
 0x39d   : > { %v3095_v62 = vadd.f32 %v3089_v61, %v2935_v60  ;;  %v4088_v2 = vpop.f32.mrb[33].mxu1 }
 0x3a0   : > { %v3249_v3 = vpop.f32.mrb[34].mxu1 }
 0x3a1   : > { %v3255_v5 = vadd.f32 %v3249_v3, %v3095_v62  ;;  %v4093_v8 = vpop.f32.mrb[35].mxu1 }
 0x3a3   : > { %v3264_v9 = vadd.f32 %v3260_v4, %v3255_v5 }
 0x3a5   : > { %v3267_v10 = vmax.f32 %v3264_v9, 0.0 }
 0x3a7   : > { %3275 = vrot.lane.b32.xlu1 %v3267_v10, %s4382_s22 }
 0x3ba   : > { %v3178_v11 = vpop.f32.mrb[2].mxu0 }
 0x3bb   : > { %v3262_v14 = vadd.f32 %v3260_v4, %v3178_v11  ;;  %v3180_v15 = vpop.f32.mrb[3].mxu0 }
 0x3bc   : > { %v3263_v16 = vadd.f32 %v3260_v4, %v3180_v15 }
 0x3bd   : > { %v3265_v17 = vmax.f32 %v3262_v14, 0.0 }
 0x3be   : > { %v3266_v20 = vmax.f32 %v3263_v16, 0.0 }
 0x3c0   : > { %v4305_v21 = vpack.i.bf16 %v3265_v17, %v3266_v20 }
 0x3c2   : > { %4306 = vrot.lane.b32.xlu0 %v4305_v21, %s4382_s22  ;;  %s296_s22 = sand.u32 1, %s4370_s28  }
 0x3c3   : > { %s3713_s21 = scalar_lea.sflag [#allocation4], %s296_s22 }
 0x3da   : > { %v3948_v23 = vpop.f32.mrb[4].mxu0 }
 0x3db   : > { %v3949_v24 = vpop.f32.mrb[5].mxu0 }
 0x3dc   : > { %v3950_v28 = vadd.f32 %v3949_v24, %v3948_v23 }
 0x3e8   : > { %v3486_v29 = vpop.f32.mrb[6].mxu0 }
 0x3e9   : > { %v3487_v32 = vadd.f32 %v3950_v28, %v3486_v29  ;;  %v4110_v33 = vpop.f32.mrb[7].mxu0 }
 0x3eb   : > { %4112 = vmatpush3.msk.msra.mxu1 %vm325_vm1, %v3487_v32 }
 0x3ec   : > { %4175 = vmatprep.subr.bf16.mxu1 %v4787_v40  ;;  %4114 = vmatmul.mubr.msk.f32.vlgmr.msra.gmra.mrb[36].mxu1 %vm321_vm3, %v3490_v36 }
 0x3ed   : > { %4177 = vmatpush3.bf16.msra.mxu1 %v4805_v46 }
 0x3ee   : > { %4179 = vmatprep.subr.bf16.mxu1 %v4807_v47 }
 0x3f1   : > { %4181 = vmatpush3.bf16.msra.mxu1 %v4824_v52 }
 0x3f2   : > { %4183 = vmatprep.subr.bf16.mxu1 %v4827_v53 }
 0x3f5   : > { %4185 = vmatpush3.bf16.msra.mxu1 %v4842_v57 }
 0x3f6   : > { %4187 = vmatprep.subr.bf16.mxu1 %v4845_v58 }
 0x3f9   : > { %4189 = vmatpush3.bf16.msra.mxu1 %v4860_v63 }
 0x3fa   : > { %4191 = vmatprep.subr.bf16.mxu1 %v4863_v1 }
 0x3fd   : > { %4193 = vmatpush3.bf16.msra.mxu1 %v4878_v6 }
 0x3fe   : > { %4195 = vmatprep.subr.bf16.mxu1 %v4881_v7 }
 0x401   : > { %4197 = vmatpush3.bf16.msra.mxu1 %v4896_v12 }
 0x402   : > { %4199 = vmatprep.subr.bf16.mxu1 %v4899_v13 }
 0x405   : > { %4201 = vmatpush3.bf16.msra.mxu1 %v4914_v18 }
 0x406   : > { %4203 = vmatprep.subr.bf16.mxu1 %v4917_v19 }
 0x409   : > { %4205 = vmatpush3.bf16.msra.mxu1 %v4926_v22 }
 0x40a   : > { %4206 = vmatprep.subr.bf16.mxu1 %v4392_v27 }
 0x419   : > { %v3276_v37 = vpop.permute.xlu1 %3275 }
 0x41a   : > { %v3284_v38 = vmax.f32 %v3267_v10, %v3276_v37 }
 0x41c   : > { %3292 = vrot.lane.b32.xlu1 %v3284_v38, %s4384_s24 }
 0x434   : > { %v4307_v40 = vpop.permute.xlu0 %4306 }
 0x435   : > { %v4309_v46 = vunpack.i.h.bf16 %v4307_v40  ;;  %v4308_v47 = vunpack.i.l.bf16 %v4307_v40 }
 0x437   : > { %v3277_v52 = vsel %vm318_vm2, %v4309_v46, %v4308_v47  ;;  %v3278_v53 = vsel %vm318_vm2, %v4308_v47, %v3276_v37 }
 0x438   : > { %v3282_v57 = vmax.f32 %v3265_v17, %v3277_v52  ;;  %v3283_v58 = vmax.f32 %v3266_v20, %v3278_v53 }
 0x43a   : > { %v4310_v63 = vpack.i.bf16 %v3282_v57, %v3283_v58 }
 0x43c   : > { %4311 = vrot.lane.b32.xlu0 %v4310_v63, %s4384_s24  ;;  %s3789_s24 = sshll.u32 %s296_s22, 3 }
 0x43d   : > { %s298_s26 = scalar_lea.vmem [#allocation3], %s3789_s24 }
 0x43e   : > { %s3726_s10 = sshll.u32 %s298_s26, 4  ;;  %s5021_s10 = int_to_ptr.vmem [resolvable:$true] %s3726_s10 }
 0x43f   : > { %s4316_s17 = scalar_lea.vmem %s5021_s10, 128  ;;  %p4323_p0 = scmp.lt.s32.totalorder %s5021_s10, %s4321_s18 }
 0x440   : > { %p4317_p11 = scmp.ne.s32.totalorder %s5021_s10, %s4316_s17  ;;  %p4324_p1 = scmp.lt.s32.totalorder %s4322_s19, %s4316_s17 }
 0x442   : > { %p4318_p12 = pnand %p4317_p11, %p4477_p5  ;;  %p4325_p2 = por %p4324_p1, %p4323_p0 }
 0x444   : > { %p4319_p13 = pneg %p4318_p12 }
 0x446   : > { %p4326_p3 = pnand %p4325_p2, %p4319_p13 }
 0x48e   : > { %v3293_v12 = vpop.permute.xlu1 %3292 }
 0x48f   : > { %v3301_v39 = vmax.f32 %v3284_v38, %v3293_v12 }
 0x4ae   : > { %v4312_v1 = vpop.permute.xlu0 %4311 }
 0x4af   : > { %v4314_v6 = vunpack.i.h.bf16 %v4312_v1  ;;  %v4313_v7 = vunpack.i.l.bf16 %v4312_v1 }
 0x4b1   : > { %v3294_v13 = vsel %vm795_vm5, %v4314_v6, %v4313_v7  ;;  %v3295_v18 = vsel %vm795_vm5, %v4313_v7, %v3293_v12 }
 0x4b2   : > { %v3299_v19 = vmax.f32 %v3282_v57, %v3294_v13  ;;  %v3300_v22 = vmax.f32 %v3283_v58, %v3295_v18 }
 0x4b4   : > { %3634 = vmatprep.mubr.f32.mxu1 %v3300_v22 }
 0x4b5   : > { %3635 = vmatmul.mubr.f32.vlgmr.msra.gmra.mrb[38].mxu1 %v3299_v19 }
 0x4b6   : > { %4208 = vmatpush3.bf16.msra.mxu1 %v4936_v25  ;;  %4130 = vmatprep.mubr.msk.f32.mxu1 %vm4381_vm0, %v4380_v0  ;;  %vm3710_vm0 = vcmask 523264  }
 0x4b7   : > { %4209 = vmatprep.subr.bf16.mxu1 %v4392_v27 }
 0x4ba   : > { %4211 = vmatpush3.bf16.msra.mxu1 %v4947_v31 }
 0x4bb   : > { %4212 = vmatprep.subr.bf16.mxu1 %v4392_v27 }
 0x4be   : > { %4214 = vmatpush3.bf16.msra.mxu1 %v4959_v35 }
 0x4bf   : > { %4128 = vmatprep.subr.mxu1 %v4380_v0 }
 0x4c2   : > { %4129 = vmatpush3.msk.msra.mxu1 %vm3346_vm4, %v4967_v34 }
 0x4c3   : > { %4131 = vmatmul.mubr.msk.f32.vlgmr.msra.gmra.mrb[36].mxu1 %vm3343_vm6, %v3301_v39 }
 0x588   : > { %v3993_v25 = vpop.f32.mrb[38].mxu1 }
 0x589   : > { %v3994_v41 = vpop.f32.mrb[39].mxu1 }
 0x58a   : > { %v3995_v42 = vadd.f32 %v3994_v41, %v3993_v25 }
 0x596   : > { %v3706_v27 = vpop.f32.mrb[36].mxu1 }
 0x597   : > { %v4215_v31 = vadd.f32 %v3995_v42, %v3706_v27  ;;  %v4132_v35 = vpop.f32.mrb[37].mxu1 }
 0x599   : > { %3711 = vst.msk [vmem:[%s298_s26] sm:$0xff] %vm3710_vm0, %v4215_v31 }
 0x59a   : > { %4329 = shalt.err (!%p4326_p3)
}
 0x59b   : > { %s4330_s23 = scalar_lea.hbm %s5019_s20, 128  ;;  %s4334_s25 = scalar_lea.hbm %s5069_s8, 256 }
 0x59c   : > { %p4331_p4 = scmp.ne.s32.totalorder %s5019_s20, %s4330_s23  ;;  %p4335_p9 = scmp.lt.u32.totalorder %s5019_s20, %s5069_s8 }
 0x59d   : > { %p4336_p10 = scmp.lt.u32.totalorder %s4334_s25, %s4330_s23  ;;  %p4338_p12 = scmp.lt.u32.totalorder %s4330_s23, %s5019_s20 }
 0x59e   : > { %p4332_p7 = pnand %p4331_p4, %p4477_p5 }
 0x59f   : > { %p4337_p11 = por %p4336_p10, %p4335_p9 }
 0x5a0   : > { %p4333_p8 = pneg %p4332_p7 }
 0x5a1   : > { %p4339_p13 = por %p4338_p12, %p4337_p11 }
 0x5a3   : > { %p4340_p0 = pnand %p4339_p13, %p4333_p8 }
 0x5a5   : > { %4343 = shalt.err (!%p4340_p0)
}
 0x5a6   : > { %4251 = dma.vmem_to_hbm [thread:$0]  (%p4477_p5), %s5021_s10, 128, %s5019_s20, %s3713_s21  }
 0x5a7 PF: > { %p4257_p1 = scmp.ge.s32.totalorder %s4378_s30, 2  ;;  %s3738_s13 = sand.u32 1, %s4366_s27  }
 0x5a8   : > { %s3739_s17 = scalar_lea.sflag [#allocation4], %s3738_s13 }
 0x5a9   : > { %p4254_p2 = pnand %p4257_p1, %p4481_p6 }
 0x5ab   : > { %4361 = dma.done.wait (!%p4254_p2), %s3739_s17, 128  }
 0x5ac   : > { %4363 = vsyncadd (!%p4254_p2), %s3739_s17, 4294967168  ;;  %p18_p3 = scmp.ge.s32.totalorder %s4464_s11, 4   ;;  %s5072_s27 = smov %s4370_s28 }
 0x5ad   : > { %s5073_s28 = smov %s4374_s29  ;;  %s5074_s29 = smov %s4475_s14 }
 0x5ae   : > { %s5075_s30 = smov %s4464_s11  ;;  %20 = sbr.rel (!%p18_p3) target bundleno = 3 (0x3), region = 103 }
 0x5b5   :  { %3744 = vsyncpa [#allocation4], 1 }
 0x5b6   :  { %3746 = vsyncpa [#allocation4 + $0x1], 1 }

</bundles_post_ra>
